<compile_context>
chip_gen: v7x
topology: tpu7x:2x2x1
jax: 0.10.0
libtpu: 0.0.40
codegen_flags: <defaults>
</compile_context>

<pallas_src>
import math

import jax
import jax.numpy as jnp
from jax import lax
from jax.experimental import pallas as pl
from jax.experimental.pallas import tpu as pltpu


def _round_up(v, m):
    return ((v + m - 1) // m) * m


def _physical_vmem_bytes():
    """Best-effort physical VMEM query; conservative (v7x) fallback."""
    try:
        return int(pltpu.get_tpu_info().vmem_capacity_bytes)
    except Exception:
        return 64 * 1024 * 1024


def _lstm_model_kernel(x_ref, w_in_ref, b_in_ref, w_ih_ref, w_hh_ref,
                       b_g_ref, w_out_ref, b_out_ref, out_ref,
                       h_state, c_state, pg_scratch, h_scratch):
    Tc, Bp, nxp = x_ref.shape
    Hp = h_state.shape[1]

    # zero-init hidden / cell state on the first chunk (hx=None, cx=None path)
    @pl.when(pl.program_id(0) == 0)
    def _():
        h_state[...] = jnp.zeros_like(h_state)
        c_state[...] = jnp.zeros_like(c_state)

    # ---- phase 1: all non-recurrent matmuls for this chunk (MXU-dense) -----
    xb = x_ref[...].reshape(Tc * Bp, nxp)
    x0 = jnp.maximum(
        jnp.dot(xb, w_in_ref[...], preferred_element_type=jnp.float32)
        + b_in_ref[...],
        0.0,
    )                                                      # (Tc*Bp, Hp) f32
    pg = (
        jnp.dot(x0.astype(w_ih_ref.dtype), w_ih_ref[...],
                preferred_element_type=jnp.float32)
        + b_g_ref[...]
    )                                                      # (Tc*Bp, 4Hp) f32
    pg_scratch[...] = pg.reshape(Tc, Bp, 4 * Hp)

    # ---- phase 2: sequential recurrence; only h @ W_hh on critical path ----
    def step(t, carry):
        h, c = carry
        gates = pg_scratch[t] + jnp.dot(
            h.astype(w_hh_ref.dtype), w_hh_ref[...],
            preferred_element_type=jnp.float32)            # (Bp, 4Hp) f32
        # gate layout after wrapper reorder: [ i | f | o | g ]
        sig = jax.nn.sigmoid(gates[:, :3 * Hp])            # one contiguous slab
        g_g = jnp.tanh(gates[:, 3 * Hp:])
        i_g = sig[:, 0 * Hp:1 * Hp]
        f_g = sig[:, 1 * Hp:2 * Hp]
        o_g = sig[:, 2 * Hp:3 * Hp]
        c_new = f_g * c + i_g * g_g
        h_new = o_g * jnp.tanh(c_new)
        h_scratch[t] = h_new.astype(h_scratch.dtype)       # bf16 (default)
        return h_new, c_new

    # fixed partial unroll: lets next pregate load / current hidden store
    # overlap the sigmoid/tanh EUP chain without blowing vreg pressure.
    unroll = 8 if Hp <= 256 else 4
    unroll = max(1, min(unroll, Tc))
    h_f, c_f = lax.fori_loop(0, Tc, step, (h_state[...], c_state[...]),
                             unroll=unroll)
    h_state[...] = h_f
    c_state[...] = c_f

    # ---- phase 3: linear_out for the whole chunk, single lane-dense store ---
    hb = h_scratch[...].reshape(Tc * Bp, Hp)               # already matmul dtype
    out = (
        jnp.dot(hb, w_out_ref[...], preferred_element_type=jnp.float32)
        + b_out_ref[...]
    )
    out_ref[...] = out.reshape(Tc, Bp, out_ref.shape[-1]).astype(out_ref.dtype)


def lstm_model_forward(x, params, *, matmul_dtype=jnp.bfloat16, t_chunk=None,
                       vmem_limit_bytes=None):
    """x: (T, B, nx) float32.  Returns (T, B, ny) float32."""
    T, B, nx = x.shape
    H = params["w_in"].shape[0]          # linear_in weight: (H, nx)
    ny = params["w_out"].shape[0]        # linear_out weight: (ny, H)

    B_pad = _round_up(B, 8)
    nx_pad = _round_up(nx, 128)
    H_pad = _round_up(H, 128)
    ny_pad = _round_up(ny, 128)

    is_bf16 = jnp.dtype(matmul_dtype) == jnp.dtype(jnp.bfloat16)
    out_dtype = jnp.bfloat16 if is_bf16 else jnp.float32

    # --- weight prep: transpose, reorder gates (i,f,g,o)->(i,f,o,g), pad -----
    def prep_gate_w(w):                  # (4H, in_dim), row blocks [i; f; g; o]
        wt = w.T                         # (in_dim, 4H), col blocks [i|f|g|o]
        in_dim = wt.shape[0]
        blocks = [wt[:, k * H:(k + 1) * H] for k in (0, 1, 3, 2)]
        blocks = [jnp.pad(b, ((0, H_pad - in_dim), (0, H_pad - H)))
                  for b in blocks]
        return jnp.concatenate(blocks, axis=1).astype(matmul_dtype)

    def prep_gate_b(b_ih, b_hh):         # folded single bias, reordered+padded
        b = b_ih + b_hh
        blocks = [b[k * H:(k + 1) * H] for k in (0, 1, 3, 2)]
        blocks = [jnp.pad(v, (0, H_pad - H)) for v in blocks]
        return jnp.concatenate(blocks).reshape(1, 4 * H_pad).astype(jnp.float32)

    w_in = jnp.pad(params["w_in"].T,
                   ((0, nx_pad - nx), (0, H_pad - H))).astype(matmul_dtype)
    b_in = jnp.pad(params["b_in"], (0, H_pad - H)
                   ).reshape(1, H_pad).astype(jnp.float32)
    w_ih = prep_gate_w(params["w_ih"])                       # (H_pad, 4H_pad)
    w_hh = prep_gate_w(params["w_hh"])                       # (H_pad, 4H_pad)
    b_g = prep_gate_b(params["b_ih"], params["b_hh"])        # (1, 4H_pad)
    w_out = jnp.pad(params["w_out"].T,
                    ((0, H_pad - H), (0, ny_pad - ny))).astype(matmul_dtype)
    b_out = jnp.pad(params["b_out"], (0, ny_pad - ny)
                    ).reshape(1, ny_pad).astype(jnp.float32)

    # --- VMEM budget (generation-aware) and chunk sizing ---------------------
    if vmem_limit_bytes is None:
        # ~75% of physical: ~96 MiB on v5e/v6e (128 MiB), ~48 MiB on v7x (64).
        vmem_limit_bytes = (_physical_vmem_bytes() * 3) // 4
    vmem_limit_bytes = int(vmem_limit_bytes)

    bm = jnp.dtype(matmul_dtype).itemsize
    ob = jnp.dtype(out_dtype).itemsize

    if t_chunk is None:
        # Fixed (chunk-independent) VMEM consumers:
        weight_bytes = ((nx_pad * H_pad + 2 * H_pad * 4 * H_pad
                         + H_pad * ny_pad) * bm
                        + (H_pad + 4 * H_pad + ny_pad) * 4)   # f32 biases
        # count weights x2: the pipeline reserves double buffers even for
        # constant-index (resident) blocks; plus f32 h/c state.
        fixed = 2 * weight_bytes + 2 * B_pad * H_pad * 4
        # Per-timestep (scales with t_chunk):
        per_t = B_pad * (
            2 * nx_pad * bm          # x block (double-buffered)
            + 2 * ny_pad * ob        # out block (double-buffered)
            + 4 * H_pad * 4          # pg_scratch (f32)
            + H_pad * bm             # h_scratch (matmul dtype)
            + H_pad * 4              # phase-1 x0 intermediate (f32)
            + 4 * H_pad * bm         # casted matmul-operand copies (margin)
        )
        headroom = 2 * 1024 * 1024   # compiler-internal scratch / slack
        budget = max(per_t, vmem_limit_bytes - fixed - headroom)
        cap = max(1, budget // per_t)
        t_chunk = int(min(cap, T))
        # When VMEM forces multiple chunks, keep M = t_chunk*B_pad MXU-aligned
        # (multiple of 256 for B_pad=8); a single chunk just takes all of T.
        if t_chunk < T and t_chunk >= 32:
            t_chunk -= t_chunk % 32
    t_chunk = max(1, int(t_chunk))

    # Pad T up to a multiple of t_chunk.  Tail timesteps see zero inputs and
    # are causally inert for the real outputs; they are sliced off below.
    T_pad = _round_up(T, t_chunk)

    x_p = jnp.pad(x, ((0, T_pad - T), (0, B_pad - B), (0, nx_pad - nx))
                  ).astype(matmul_dtype)                     # (T_pad, B_pad, nx_pad)

    full2 = lambda shape: pl.BlockSpec(shape, lambda i: (0, 0))

    out_padded = pl.pallas_call(
        _lstm_model_kernel,
        out_shape=jax.ShapeDtypeStruct((T_pad, B_pad, ny_pad), out_dtype),
        grid_spec=pltpu.PrefetchScalarGridSpec(
            num_scalar_prefetch=0,
            grid=(T_pad // t_chunk,),
            in_specs=[
                pl.BlockSpec((t_chunk, B_pad, nx_pad), lambda i: (i, 0, 0)),
                full2((nx_pad, H_pad)),            # W_in   (resident: constant idx)
                full2((1, H_pad)),                 # b_in
                full2((H_pad, 4 * H_pad)),         # W_ih
                full2((H_pad, 4 * H_pad)),         # W_hh
                full2((1, 4 * H_pad)),             # b_ih + b_hh (folded)
                full2((H_pad, ny_pad)),            # W_out
                full2((1, ny_pad)),                # b_out
            ],
            out_specs=pl.BlockSpec((t_chunk, B_pad, ny_pad),
                                   lambda i: (i, 0, 0)),
            scratch_shapes=[
                pltpu.VMEM((B_pad, H_pad), jnp.float32),              # h state
                pltpu.VMEM((B_pad, H_pad), jnp.float32),              # c state
                pltpu.VMEM((t_chunk, B_pad, 4 * H_pad), jnp.float32), # pregates
                pltpu.VMEM((t_chunk, B_pad, H_pad), matmul_dtype),    # hiddens
            ],
        ),
        compiler_params=pltpu.CompilerParams(
            # Recurrence (h/c scratch across grid steps) requires the time-chunk
            # axis to stay sequential; do NOT mark it "parallel".
            dimension_semantics=("arbitrary",),
            vmem_limit_bytes=vmem_limit_bytes,
        ),
    )(x_p, w_in, b_in, w_ih, w_hh, b_g, w_out, b_out)

    return out_padded[:T, :B, :ny].astype(jnp.float32)


def _init_params(key, nx, ny, hidden_size):
    """Deterministic synthetic init mirroring the module's parameter shapes."""
    ks = jax.random.split(key, 8)
    stdv_lstm = 1.0 / math.sqrt(hidden_size)   # Lstm.reset_parameters
    stdv_in = 1.0 / math.sqrt(nx)              # nn.Linear default
    stdv_out = 1.0 / math.sqrt(hidden_size)
    u = lambda k, shape, s: jax.random.uniform(k, shape, jnp.float32, -s, s)
    return {
        "w_in": u(ks[0], (hidden_size, nx), stdv_in),
        "b_in": u(ks[1], (hidden_size,), stdv_in),
        "w_ih": u(ks[2], (4 * hidden_size, hidden_size), stdv_lstm),
        "w_hh": u(ks[3], (4 * hidden_size, hidden_size), stdv_lstm),
        "b_ih": u(ks[4], (4 * hidden_size,), stdv_lstm),
        "b_hh": u(ks[5], (4 * hidden_size,), stdv_lstm),
        "w_out": u(ks[6], (ny, hidden_size), stdv_out),
        "b_out": u(ks[7], (ny,), stdv_out),
    }


def _reference_forward(x, params):
    """Pure-JAX reference (lax.scan) for correctness check."""
    H = params["w_in"].shape[0]
    x0 = jax.nn.relu(jnp.einsum("tbi,hi->tbh", x, params["w_in"]) + params["b_in"])
    B = x.shape[1]
    h0 = jnp.zeros((B, H), jnp.float32)
    c0 = jnp.zeros((B, H), jnp.float32)

    def step(carry, xt):
        h, c = carry
        gates = (xt @ params["w_ih"].T + params["b_ih"]
                 + h @ params["w_hh"].T + params["b_hh"])
        i, f, g, o = jnp.split(gates, 4, axis=-1)
        c = jax.nn.sigmoid(f) * c + jax.nn.sigmoid(i) * jnp.tanh(g)
        h = jax.nn.sigmoid(o) * jnp.tanh(c)
        return (h, c), h

    _, hs = jax.lax.scan(step, (h0, c0), x0)
    return jnp.einsum("tbh,oh->tbo", hs, params["w_out"]) + params["b_out"]


if __name__ == "__main__":
    # small shapes consistent with the module: seq=8, batch=2, nx=4, hidden=32, ny=1
    T, B, NX, H, NY = 8, 2, 4, 32, 1
    key = jax.random.PRNGKey(0)
    k_x, k_p = jax.random.split(key)
    x = jax.random.normal(k_x, (T, B, NX), jnp.float32)
    params = _init_params(k_p, NX, NY, H)

    ref = jax.block_until_ready(_reference_forward(x, params))

    # Default path: bf16 MXU operands + bf16 output storage, f32 accumulation /
    # gate math / state.  Loose tolerance for bf16 operand rounding.
    out_bf16 = jax.block_until_ready(lstm_model_forward(x, params))
    assert out_bf16.shape == (T, B, NY)
    assert jnp.allclose(out_bf16, ref, atol=5e-2, rtol=5e-2), \
        "Pallas bf16 output mismatch vs JAX reference"

    # f32 operand path: tight numerical check.
    out_f32 = jax.block_until_ready(
        lstm_model_forward(x, params, matmul_dtype=jnp.float32))
    assert out_f32.shape == (T, B, NY)
    assert jnp.allclose(out_f32, ref, atol=1e-4, rtol=1e-4), \
        "Pallas f32 output mismatch vs JAX reference"

    # Non-divisible T + explicit small chunk: exercises T padding and the
    # multi-chunk recurrence carry (h/c scratch across grid steps).
    T2, B2, NX2, NY2 = 13, 3, 5, 2
    x2 = jax.random.normal(jax.random.PRNGKey(1), (T2, B2, NX2), jnp.float32)
    p2 = _init_params(jax.random.PRNGKey(2), NX2, NY2, H)
    ref2 = jax.block_until_ready(_reference_forward(x2, p2))
    out2 = jax.block_until_ready(
        lstm_model_forward(x2, p2, matmul_dtype=jnp.float32, t_chunk=4))
    assert out2.shape == (T2, B2, NY2)
    assert jnp.allclose(out2, ref2, atol=1e-4, rtol=1e-4), \
        "Pallas multi-chunk output mismatch vs JAX reference"

    print("KERNEL_OK")
</pallas_src>

<mosaic_0001>
module attributes {stable_mosaic.version = 11 : i64} {
  func.func @_lstm_model_kernel(%arg0: i32, %arg1: memref<8x8x128xbf16, #tpu.memory_space<vmem>>, %arg2: memref<128x128xbf16, #tpu.memory_space<vmem>>, %arg3: memref<1x128xf32, #tpu.memory_space<vmem>>, %arg4: memref<128x512xbf16, #tpu.memory_space<vmem>>, %arg5: memref<128x512xbf16, #tpu.memory_space<vmem>>, %arg6: memref<1x512xf32, #tpu.memory_space<vmem>>, %arg7: memref<128x128xbf16, #tpu.memory_space<vmem>>, %arg8: memref<1x128xf32, #tpu.memory_space<vmem>>, %arg9: memref<8x8x128xbf16, #tpu.memory_space<vmem>>, %arg10: memref<8x128xf32, #tpu.memory_space<vmem>>, %arg11: memref<8x128xf32, #tpu.memory_space<vmem>>, %arg12: memref<8x8x512xf32, #tpu.memory_space<vmem>>, %arg13: memref<8x8x128xbf16, #tpu.memory_space<vmem>>) attributes {dimension_semantics = [#tpu.dimension_semantics<arbitrary>], iteration_bounds = array<i64: 1>, scalar_prefetch = 0 : i64, scratch_operands = 4 : i64, tpu.core_type = #tpu.core_type<tc>, window_params = [{transform_indices = @transform_0, window_bounds = array<i64: 8, 8, 128>}, {pipeline_mode = #tpu.pipeline_mode<synchronous>, transform_indices = @transform_1, window_bounds = array<i64: 128, 128>}, {pipeline_mode = #tpu.pipeline_mode<synchronous>, transform_indices = @transform_2, window_bounds = array<i64: 1, 128>}, {pipeline_mode = #tpu.pipeline_mode<synchronous>, transform_indices = @transform_3, window_bounds = array<i64: 128, 512>}, {pipeline_mode = #tpu.pipeline_mode<synchronous>, transform_indices = @transform_4, window_bounds = array<i64: 128, 512>}, {pipeline_mode = #tpu.pipeline_mode<synchronous>, transform_indices = @transform_5, window_bounds = array<i64: 1, 512>}, {pipeline_mode = #tpu.pipeline_mode<synchronous>, transform_indices = @transform_6, window_bounds = array<i64: 128, 128>}, {pipeline_mode = #tpu.pipeline_mode<synchronous>, transform_indices = @transform_7, window_bounds = array<i64: 1, 128>}, {transform_indices = @transform_8, window_bounds = array<i64: 8, 8, 128>}]} {
    %c0_i32 = arith.constant 0 : i32
    %0 = arith.cmpi eq, %arg0, %c0_i32 : i32
    %1 = arith.extui %0 : i1 to i32
    %c0_i32_0 = arith.constant 0 : i32
    %2 = arith.cmpi ne, %1, %c0_i32_0 : i32
    scf.if %2 {
      %cst_100 = arith.constant 0.000000e+00 : f32
      %258 = vector.broadcast %cst_100 : f32 to vector<8x128xf32>
      %c0_101 = arith.constant 0 : index
      %c0_102 = arith.constant 0 : index
      %259 = vector.load %arg10[%c0_101, %c0_102] : memref<8x128xf32, #tpu.memory_space<vmem>>, vector<8x128xf32>
      tpu.vector_store %arg10[%c0_101, %c0_102], %258 {strides = array<i32>} : memref<8x128xf32, #tpu.memory_space<vmem>>, vector<8x128xf32>,
      %cst_103 = arith.constant 0.000000e+00 : f32
      %260 = vector.broadcast %cst_103 : f32 to vector<8x128xf32>
      %c0_104 = arith.constant 0 : index
      %c0_105 = arith.constant 0 : index
      %261 = vector.load %arg11[%c0_104, %c0_105] : memref<8x128xf32, #tpu.memory_space<vmem>>, vector<8x128xf32>
      tpu.vector_store %arg11[%c0_104, %c0_105], %260 {strides = array<i32>} : memref<8x128xf32, #tpu.memory_space<vmem>>, vector<8x128xf32>,
    } else {
    }
    %c0 = arith.constant 0 : index
    %c0_1 = arith.constant 0 : index
    %c0_2 = arith.constant 0 : index
    %3 = vector.load %arg1[%c0, %c0_1, %c0_2] : memref<8x8x128xbf16, #tpu.memory_space<vmem>>, vector<8x8x128xbf16>
    %4 = vector.shape_cast %3 : vector<8x8x128xbf16> to vector<64x128xbf16>
    %c0_3 = arith.constant 0 : index
    %c0_4 = arith.constant 0 : index
    %5 = vector.load %arg2[%c0_3, %c0_4] : memref<128x128xbf16, #tpu.memory_space<vmem>>, vector<128x128xbf16>
    %cst = arith.constant dense<0.000000e+00> : vector<64x128xf32>
    %6 = tpu.matmul %4, %5, %cst {dimension_numbers = #tpu.dot_dimension_numbers<[1], [0], [0], [1], [0, 0, 1, 1], [], []>} : vector<64x128xbf16>, vector<128x128xbf16>, vector<64x128xf32> -> vector<64x128xf32>
    %c0_5 = arith.constant 0 : index
    %c0_6 = arith.constant 0 : index
    %7 = vector.load %arg3[%c0_5, %c0_6] : memref<1x128xf32, #tpu.memory_space<vmem>>, vector<1x128xf32>
    %8 = vector.broadcast %7 : vector<1x128xf32> to vector<64x128xf32>
    %9 = arith.addf %6, %8 : vector<64x128xf32>
    %cst_7 = arith.constant 0.000000e+00 : f32
    %10 = vector.broadcast %cst_7 : f32 to vector<64x128xf32>
    %11 = arith.maximumf %9, %10 : vector<64x128xf32>
    %12 = arith.truncf %11 : vector<64x128xf32> to vector<64x128xbf16>
    %c0_8 = arith.constant 0 : index
    %c0_9 = arith.constant 0 : index
    %13 = vector.load %arg4[%c0_8, %c0_9] : memref<128x512xbf16, #tpu.memory_space<vmem>>, vector<128x512xbf16>
    %cst_10 = arith.constant dense<0.000000e+00> : vector<64x512xf32>
    %14 = tpu.matmul %12, %13, %cst_10 {dimension_numbers = #tpu.dot_dimension_numbers<[1], [0], [0], [1], [0, 0, 1, 1], [], []>} : vector<64x128xbf16>, vector<128x512xbf16>, vector<64x512xf32> -> vector<64x512xf32>
    %c0_11 = arith.constant 0 : index
    %c0_12 = arith.constant 0 : index
    %15 = vector.load %arg6[%c0_11, %c0_12] : memref<1x512xf32, #tpu.memory_space<vmem>>, vector<1x512xf32>
    %16 = vector.broadcast %15 : vector<1x512xf32> to vector<64x512xf32>
    %17 = arith.addf %14, %16 : vector<64x512xf32>
    %18 = vector.shape_cast %17 : vector<64x512xf32> to vector<8x8x512xf32>
    %c0_13 = arith.constant 0 : index
    %c0_14 = arith.constant 0 : index
    %c0_15 = arith.constant 0 : index
    %19 = vector.load %arg12[%c0_13, %c0_14, %c0_15] : memref<8x8x512xf32, #tpu.memory_space<vmem>>, vector<8x8x512xf32>
    tpu.vector_store %arg12[%c0_13, %c0_14, %c0_15], %18 {strides = array<i32>} : memref<8x8x512xf32, #tpu.memory_space<vmem>>, vector<8x8x512xf32>,
    %c0_16 = arith.constant 0 : index
    %c0_17 = arith.constant 0 : index
    %20 = vector.load %arg10[%c0_16, %c0_17] : memref<8x128xf32, #tpu.memory_space<vmem>>, vector<8x128xf32>
    %c0_18 = arith.constant 0 : index
    %c0_19 = arith.constant 0 : index
    %21 = vector.load %arg11[%c0_18, %c0_19] : memref<8x128xf32, #tpu.memory_space<vmem>>, vector<8x128xf32>
    %c0_i32_20 = arith.constant 0 : i32
    %22 = arith.index_cast %c0_i32_20 : i32 to index
    %c0_21 = arith.constant 0 : index
    %c0_22 = arith.constant 0 : index
    %23 = vector.load %arg12[%22, %c0_21, %c0_22] : memref<8x8x512xf32, #tpu.memory_space<vmem>>, vector<1x8x512xf32>
    %24 = vector.shape_cast %23 : vector<1x8x512xf32> to vector<8x512xf32>
    %25 = arith.truncf %20 : vector<8x128xf32> to vector<8x128xbf16>
    %c0_23 = arith.constant 0 : index
    %c0_24 = arith.constant 0 : index
    %26 = vector.load %arg5[%c0_23, %c0_24] : memref<128x512xbf16, #tpu.memory_space<vmem>>, vector<128x512xbf16>
    %cst_25 = arith.constant dense<0.000000e+00> : vector<8x512xf32>
    %27 = tpu.matmul %25, %26, %cst_25 {dimension_numbers = #tpu.dot_dimension_numbers<[1], [0], [0], [1], [0, 0, 1, 1], [], []>} : vector<8x128xbf16>, vector<128x512xbf16>, vector<8x512xf32> -> vector<8x512xf32>
    %28 = arith.addf %24, %27 : vector<8x512xf32>
    %29 = vector.extract_strided_slice %28 {offsets = [0, 0], sizes = [8, 384], strides = [1, 1]} : vector<8x512xf32> to vector<8x384xf32>
    %30 = arith.negf %29 : vector<8x384xf32>
    %31 = math.exp %30 : vector<8x384xf32>
    %cst_26 = arith.constant 1.000000e+00 : f32
    %32 = vector.broadcast %cst_26 : f32 to vector<8x384xf32>
    %33 = arith.addf %32, %31 : vector<8x384xf32>
    %34 = arith.divf %32, %33 : vector<8x384xf32>
    %35 = vector.extract_strided_slice %28 {offsets = [0, 384], sizes = [8, 128], strides = [1, 1]} : vector<8x512xf32> to vector<8x128xf32>
    %36 = math.tanh %35 : vector<8x128xf32>
    %37 = vector.extract_strided_slice %34 {offsets = [0, 0], sizes = [8, 128], strides = [1, 1]} : vector<8x384xf32> to vector<8x128xf32>
    %38 = vector.extract_strided_slice %34 {offsets = [0, 128], sizes = [8, 128], strides = [1, 1]} : vector<8x384xf32> to vector<8x128xf32>
    %39 = vector.extract_strided_slice %34 {offsets = [0, 256], sizes = [8, 128], strides = [1, 1]} : vector<8x384xf32> to vector<8x128xf32>
    %40 = arith.mulf %38, %21 : vector<8x128xf32>
    %41 = arith.mulf %37, %36 : vector<8x128xf32>
    %42 = arith.addf %40, %41 : vector<8x128xf32>
    %43 = math.tanh %42 : vector<8x128xf32>
    %44 = arith.mulf %39, %43 : vector<8x128xf32>
    %45 = arith.truncf %44 : vector<8x128xf32> to vector<8x128xbf16>
    %46 = arith.index_cast %c0_i32_20 : i32 to index
    %c0_27 = arith.constant 0 : index
    %c0_28 = arith.constant 0 : index
    %47 = vector.load %arg13[%46, %c0_27, %c0_28] : memref<8x8x128xbf16, #tpu.memory_space<vmem>>, vector<1x8x128xbf16>
    %48 = vector.shape_cast %47 : vector<1x8x128xbf16> to vector<8x128xbf16>
    %49 = vector.shape_cast %45 : vector<8x128xbf16> to vector<1x8x128xbf16>
    tpu.vector_store %arg13[%46, %c0_27, %c0_28], %49 {strides = array<i32>} : memref<8x8x128xbf16, #tpu.memory_space<vmem>>, vector<1x8x128xbf16>,
    %c1_i32 = arith.constant 1 : i32
    %50 = arith.index_cast %c1_i32 : i32 to index
    %c0_29 = arith.constant 0 : index
    %c0_30 = arith.constant 0 : index
    %51 = vector.load %arg12[%50, %c0_29, %c0_30] : memref<8x8x512xf32, #tpu.memory_space<vmem>>, vector<1x8x512xf32>
    %52 = vector.shape_cast %51 : vector<1x8x512xf32> to vector<8x512xf32>
    %53 = arith.truncf %44 : vector<8x128xf32> to vector<8x128xbf16>
    %c0_31 = arith.constant 0 : index
    %c0_32 = arith.constant 0 : index
    %54 = vector.load %arg5[%c0_31, %c0_32] : memref<128x512xbf16, #tpu.memory_space<vmem>>, vector<128x512xbf16>
    %cst_33 = arith.constant dense<0.000000e+00> : vector<8x512xf32>
    %55 = tpu.matmul %53, %54, %cst_33 {dimension_numbers = #tpu.dot_dimension_numbers<[1], [0], [0], [1], [0, 0, 1, 1], [], []>} : vector<8x128xbf16>, vector<128x512xbf16>, vector<8x512xf32> -> vector<8x512xf32>
    %56 = arith.addf %52, %55 : vector<8x512xf32>
    %57 = vector.extract_strided_slice %56 {offsets = [0, 0], sizes = [8, 384], strides = [1, 1]} : vector<8x512xf32> to vector<8x384xf32>
    %58 = arith.negf %57 : vector<8x384xf32>
    %59 = math.exp %58 : vector<8x384xf32>
    %cst_34 = arith.constant 1.000000e+00 : f32
    %60 = vector.broadcast %cst_34 : f32 to vector<8x384xf32>
    %61 = arith.addf %60, %59 : vector<8x384xf32>
    %62 = arith.divf %60, %61 : vector<8x384xf32>
    %63 = vector.extract_strided_slice %56 {offsets = [0, 384], sizes = [8, 128], strides = [1, 1]} : vector<8x512xf32> to vector<8x128xf32>
    %64 = math.tanh %63 : vector<8x128xf32>
    %65 = vector.extract_strided_slice %62 {offsets = [0, 0], sizes = [8, 128], strides = [1, 1]} : vector<8x384xf32> to vector<8x128xf32>
    %66 = vector.extract_strided_slice %62 {offsets = [0, 128], sizes = [8, 128], strides = [1, 1]} : vector<8x384xf32> to vector<8x128xf32>
    %67 = vector.extract_strided_slice %62 {offsets = [0, 256], sizes = [8, 128], strides = [1, 1]} : vector<8x384xf32> to vector<8x128xf32>
    %68 = arith.mulf %66, %42 : vector<8x128xf32>
    %69 = arith.mulf %65, %64 : vector<8x128xf32>
    %70 = arith.addf %68, %69 : vector<8x128xf32>
    %71 = math.tanh %70 : vector<8x128xf32>
    %72 = arith.mulf %67, %71 : vector<8x128xf32>
    %73 = arith.truncf %72 : vector<8x128xf32> to vector<8x128xbf16>
    %74 = arith.index_cast %c1_i32 : i32 to index
    %c0_35 = arith.constant 0 : index
    %c0_36 = arith.constant 0 : index
    %75 = vector.load %arg13[%74, %c0_35, %c0_36] : memref<8x8x128xbf16, #tpu.memory_space<vmem>>, vector<1x8x128xbf16>
    %76 = vector.shape_cast %75 : vector<1x8x128xbf16> to vector<8x128xbf16>
    %77 = vector.shape_cast %73 : vector<8x128xbf16> to vector<1x8x128xbf16>
    tpu.vector_store %arg13[%74, %c0_35, %c0_36], %77 {strides = array<i32>} : memref<8x8x128xbf16, #tpu.memory_space<vmem>>, vector<1x8x128xbf16>,
    %c2_i32 = arith.constant 2 : i32
    %78 = arith.index_cast %c2_i32 : i32 to index
    %c0_37 = arith.constant 0 : index
    %c0_38 = arith.constant 0 : index
    %79 = vector.load %arg12[%78, %c0_37, %c0_38] : memref<8x8x512xf32, #tpu.memory_space<vmem>>, vector<1x8x512xf32>
    %80 = vector.shape_cast %79 : vector<1x8x512xf32> to vector<8x512xf32>
    %81 = arith.truncf %72 : vector<8x128xf32> to vector<8x128xbf16>
    %c0_39 = arith.constant 0 : index
    %c0_40 = arith.constant 0 : index
    %82 = vector.load %arg5[%c0_39, %c0_40] : memref<128x512xbf16, #tpu.memory_space<vmem>>, vector<128x512xbf16>
    %cst_41 = arith.constant dense<0.000000e+00> : vector<8x512xf32>
    %83 = tpu.matmul %81, %82, %cst_41 {dimension_numbers = #tpu.dot_dimension_numbers<[1], [0], [0], [1], [0, 0, 1, 1], [], []>} : vector<8x128xbf16>, vector<128x512xbf16>, vector<8x512xf32> -> vector<8x512xf32>
    %84 = arith.addf %80, %83 : vector<8x512xf32>
    %85 = vector.extract_strided_slice %84 {offsets = [0, 0], sizes = [8, 384], strides = [1, 1]} : vector<8x512xf32> to vector<8x384xf32>
    %86 = arith.negf %85 : vector<8x384xf32>
    %87 = math.exp %86 : vector<8x384xf32>
    %cst_42 = arith.constant 1.000000e+00 : f32
    %88 = vector.broadcast %cst_42 : f32 to vector<8x384xf32>
    %89 = arith.addf %88, %87 : vector<8x384xf32>
    %90 = arith.divf %88, %89 : vector<8x384xf32>
    %91 = vector.extract_strided_slice %84 {offsets = [0, 384], sizes = [8, 128], strides = [1, 1]} : vector<8x512xf32> to vector<8x128xf32>
    %92 = math.tanh %91 : vector<8x128xf32>
    %93 = vector.extract_strided_slice %90 {offsets = [0, 0], sizes = [8, 128], strides = [1, 1]} : vector<8x384xf32> to vector<8x128xf32>
    %94 = vector.extract_strided_slice %90 {offsets = [0, 128], sizes = [8, 128], strides = [1, 1]} : vector<8x384xf32> to vector<8x128xf32>
    %95 = vector.extract_strided_slice %90 {offsets = [0, 256], sizes = [8, 128], strides = [1, 1]} : vector<8x384xf32> to vector<8x128xf32>
    %96 = arith.mulf %94, %70 : vector<8x128xf32>
    %97 = arith.mulf %93, %92 : vector<8x128xf32>
    %98 = arith.addf %96, %97 : vector<8x128xf32>
    %99 = math.tanh %98 : vector<8x128xf32>
    %100 = arith.mulf %95, %99 : vector<8x128xf32>
    %101 = arith.truncf %100 : vector<8x128xf32> to vector<8x128xbf16>
    %102 = arith.index_cast %c2_i32 : i32 to index
    %c0_43 = arith.constant 0 : index
    %c0_44 = arith.constant 0 : index
    %103 = vector.load %arg13[%102, %c0_43, %c0_44] : memref<8x8x128xbf16, #tpu.memory_space<vmem>>, vector<1x8x128xbf16>
    %104 = vector.shape_cast %103 : vector<1x8x128xbf16> to vector<8x128xbf16>
    %105 = vector.shape_cast %101 : vector<8x128xbf16> to vector<1x8x128xbf16>
    tpu.vector_store %arg13[%102, %c0_43, %c0_44], %105 {strides = array<i32>} : memref<8x8x128xbf16, #tpu.memory_space<vmem>>, vector<1x8x128xbf16>,
    %c3_i32 = arith.constant 3 : i32
    %106 = arith.index_cast %c3_i32 : i32 to index
    %c0_45 = arith.constant 0 : index
    %c0_46 = arith.constant 0 : index
    %107 = vector.load %arg12[%106, %c0_45, %c0_46] : memref<8x8x512xf32, #tpu.memory_space<vmem>>, vector<1x8x512xf32>
    %108 = vector.shape_cast %107 : vector<1x8x512xf32> to vector<8x512xf32>
    %109 = arith.truncf %100 : vector<8x128xf32> to vector<8x128xbf16>
    %c0_47 = arith.constant 0 : index
    %c0_48 = arith.constant 0 : index
    %110 = vector.load %arg5[%c0_47, %c0_48] : memref<128x512xbf16, #tpu.memory_space<vmem>>, vector<128x512xbf16>
    %cst_49 = arith.constant dense<0.000000e+00> : vector<8x512xf32>
    %111 = tpu.matmul %109, %110, %cst_49 {dimension_numbers = #tpu.dot_dimension_numbers<[1], [0], [0], [1], [0, 0, 1, 1], [], []>} : vector<8x128xbf16>, vector<128x512xbf16>, vector<8x512xf32> -> vector<8x512xf32>
    %112 = arith.addf %108, %111 : vector<8x512xf32>
    %113 = vector.extract_strided_slice %112 {offsets = [0, 0], sizes = [8, 384], strides = [1, 1]} : vector<8x512xf32> to vector<8x384xf32>
    %114 = arith.negf %113 : vector<8x384xf32>
    %115 = math.exp %114 : vector<8x384xf32>
    %cst_50 = arith.constant 1.000000e+00 : f32
    %116 = vector.broadcast %cst_50 : f32 to vector<8x384xf32>
    %117 = arith.addf %116, %115 : vector<8x384xf32>
    %118 = arith.divf %116, %117 : vector<8x384xf32>
    %119 = vector.extract_strided_slice %112 {offsets = [0, 384], sizes = [8, 128], strides = [1, 1]} : vector<8x512xf32> to vector<8x128xf32>
    %120 = math.tanh %119 : vector<8x128xf32>
    %121 = vector.extract_strided_slice %118 {offsets = [0, 0], sizes = [8, 128], strides = [1, 1]} : vector<8x384xf32> to vector<8x128xf32>
    %122 = vector.extract_strided_slice %118 {offsets = [0, 128], sizes = [8, 128], strides = [1, 1]} : vector<8x384xf32> to vector<8x128xf32>
    %123 = vector.extract_strided_slice %118 {offsets = [0, 256], sizes = [8, 128], strides = [1, 1]} : vector<8x384xf32> to vector<8x128xf32>
    %124 = arith.mulf %122, %98 : vector<8x128xf32>
    %125 = arith.mulf %121, %120 : vector<8x128xf32>
    %126 = arith.addf %124, %125 : vector<8x128xf32>
    %127 = math.tanh %126 : vector<8x128xf32>
    %128 = arith.mulf %123, %127 : vector<8x128xf32>
    %129 = arith.truncf %128 : vector<8x128xf32> to vector<8x128xbf16>
    %130 = arith.index_cast %c3_i32 : i32 to index
    %c0_51 = arith.constant 0 : index
    %c0_52 = arith.constant 0 : index
    %131 = vector.load %arg13[%130, %c0_51, %c0_52] : memref<8x8x128xbf16, #tpu.memory_space<vmem>>, vector<1x8x128xbf16>
    %132 = vector.shape_cast %131 : vector<1x8x128xbf16> to vector<8x128xbf16>
    %133 = vector.shape_cast %129 : vector<8x128xbf16> to vector<1x8x128xbf16>
    tpu.vector_store %arg13[%130, %c0_51, %c0_52], %133 {strides = array<i32>} : memref<8x8x128xbf16, #tpu.memory_space<vmem>>, vector<1x8x128xbf16>,
    %c4_i32 = arith.constant 4 : i32
    %134 = arith.index_cast %c4_i32 : i32 to index
    %c0_53 = arith.constant 0 : index
    %c0_54 = arith.constant 0 : index
    %135 = vector.load %arg12[%134, %c0_53, %c0_54] : memref<8x8x512xf32, #tpu.memory_space<vmem>>, vector<1x8x512xf32>
    %136 = vector.shape_cast %135 : vector<1x8x512xf32> to vector<8x512xf32>
    %137 = arith.truncf %128 : vector<8x128xf32> to vector<8x128xbf16>
    %c0_55 = arith.constant 0 : index
    %c0_56 = arith.constant 0 : index
    %138 = vector.load %arg5[%c0_55, %c0_56] : memref<128x512xbf16, #tpu.memory_space<vmem>>, vector<128x512xbf16>
    %cst_57 = arith.constant dense<0.000000e+00> : vector<8x512xf32>
    %139 = tpu.matmul %137, %138, %cst_57 {dimension_numbers = #tpu.dot_dimension_numbers<[1], [0], [0], [1], [0, 0, 1, 1], [], []>} : vector<8x128xbf16>, vector<128x512xbf16>, vector<8x512xf32> -> vector<8x512xf32>
    %140 = arith.addf %136, %139 : vector<8x512xf32>
    %141 = vector.extract_strided_slice %140 {offsets = [0, 0], sizes = [8, 384], strides = [1, 1]} : vector<8x512xf32> to vector<8x384xf32>
    %142 = arith.negf %141 : vector<8x384xf32>
    %143 = math.exp %142 : vector<8x384xf32>
    %cst_58 = arith.constant 1.000000e+00 : f32
    %144 = vector.broadcast %cst_58 : f32 to vector<8x384xf32>
    %145 = arith.addf %144, %143 : vector<8x384xf32>
    %146 = arith.divf %144, %145 : vector<8x384xf32>
    %147 = vector.extract_strided_slice %140 {offsets = [0, 384], sizes = [8, 128], strides = [1, 1]} : vector<8x512xf32> to vector<8x128xf32>
    %148 = math.tanh %147 : vector<8x128xf32>
    %149 = vector.extract_strided_slice %146 {offsets = [0, 0], sizes = [8, 128], strides = [1, 1]} : vector<8x384xf32> to vector<8x128xf32>
    %150 = vector.extract_strided_slice %146 {offsets = [0, 128], sizes = [8, 128], strides = [1, 1]} : vector<8x384xf32> to vector<8x128xf32>
    %151 = vector.extract_strided_slice %146 {offsets = [0, 256], sizes = [8, 128], strides = [1, 1]} : vector<8x384xf32> to vector<8x128xf32>
    %152 = arith.mulf %150, %126 : vector<8x128xf32>
    %153 = arith.mulf %149, %148 : vector<8x128xf32>
    %154 = arith.addf %152, %153 : vector<8x128xf32>
    %155 = math.tanh %154 : vector<8x128xf32>
    %156 = arith.mulf %151, %155 : vector<8x128xf32>
    %157 = arith.truncf %156 : vector<8x128xf32> to vector<8x128xbf16>
    %158 = arith.index_cast %c4_i32 : i32 to index
    %c0_59 = arith.constant 0 : index
    %c0_60 = arith.constant 0 : index
    %159 = vector.load %arg13[%158, %c0_59, %c0_60] : memref<8x8x128xbf16, #tpu.memory_space<vmem>>, vector<1x8x128xbf16>
    %160 = vector.shape_cast %159 : vector<1x8x128xbf16> to vector<8x128xbf16>
    %161 = vector.shape_cast %157 : vector<8x128xbf16> to vector<1x8x128xbf16>
    tpu.vector_store %arg13[%158, %c0_59, %c0_60], %161 {strides = array<i32>} : memref<8x8x128xbf16, #tpu.memory_space<vmem>>, vector<1x8x128xbf16>,
    %c5_i32 = arith.constant 5 : i32
    %162 = arith.index_cast %c5_i32 : i32 to index
    %c0_61 = arith.constant 0 : index
    %c0_62 = arith.constant 0 : index
    %163 = vector.load %arg12[%162, %c0_61, %c0_62] : memref<8x8x512xf32, #tpu.memory_space<vmem>>, vector<1x8x512xf32>
    %164 = vector.shape_cast %163 : vector<1x8x512xf32> to vector<8x512xf32>
    %165 = arith.truncf %156 : vector<8x128xf32> to vector<8x128xbf16>
    %c0_63 = arith.constant 0 : index
    %c0_64 = arith.constant 0 : index
    %166 = vector.load %arg5[%c0_63, %c0_64] : memref<128x512xbf16, #tpu.memory_space<vmem>>, vector<128x512xbf16>
    %cst_65 = arith.constant dense<0.000000e+00> : vector<8x512xf32>
    %167 = tpu.matmul %165, %166, %cst_65 {dimension_numbers = #tpu.dot_dimension_numbers<[1], [0], [0], [1], [0, 0, 1, 1], [], []>} : vector<8x128xbf16>, vector<128x512xbf16>, vector<8x512xf32> -> vector<8x512xf32>
    %168 = arith.addf %164, %167 : vector<8x512xf32>
    %169 = vector.extract_strided_slice %168 {offsets = [0, 0], sizes = [8, 384], strides = [1, 1]} : vector<8x512xf32> to vector<8x384xf32>
    %170 = arith.negf %169 : vector<8x384xf32>
    %171 = math.exp %170 : vector<8x384xf32>
    %cst_66 = arith.constant 1.000000e+00 : f32
    %172 = vector.broadcast %cst_66 : f32 to vector<8x384xf32>
    %173 = arith.addf %172, %171 : vector<8x384xf32>
    %174 = arith.divf %172, %173 : vector<8x384xf32>
    %175 = vector.extract_strided_slice %168 {offsets = [0, 384], sizes = [8, 128], strides = [1, 1]} : vector<8x512xf32> to vector<8x128xf32>
    %176 = math.tanh %175 : vector<8x128xf32>
    %177 = vector.extract_strided_slice %174 {offsets = [0, 0], sizes = [8, 128], strides = [1, 1]} : vector<8x384xf32> to vector<8x128xf32>
    %178 = vector.extract_strided_slice %174 {offsets = [0, 128], sizes = [8, 128], strides = [1, 1]} : vector<8x384xf32> to vector<8x128xf32>
    %179 = vector.extract_strided_slice %174 {offsets = [0, 256], sizes = [8, 128], strides = [1, 1]} : vector<8x384xf32> to vector<8x128xf32>
    %180 = arith.mulf %178, %154 : vector<8x128xf32>
    %181 = arith.mulf %177, %176 : vector<8x128xf32>
    %182 = arith.addf %180, %181 : vector<8x128xf32>
    %183 = math.tanh %182 : vector<8x128xf32>
    %184 = arith.mulf %179, %183 : vector<8x128xf32>
    %185 = arith.truncf %184 : vector<8x128xf32> to vector<8x128xbf16>
    %186 = arith.index_cast %c5_i32 : i32 to index
    %c0_67 = arith.constant 0 : index
    %c0_68 = arith.constant 0 : index
    %187 = vector.load %arg13[%186, %c0_67, %c0_68] : memref<8x8x128xbf16, #tpu.memory_space<vmem>>, vector<1x8x128xbf16>
    %188 = vector.shape_cast %187 : vector<1x8x128xbf16> to vector<8x128xbf16>
    %189 = vector.shape_cast %185 : vector<8x128xbf16> to vector<1x8x128xbf16>
    tpu.vector_store %arg13[%186, %c0_67, %c0_68], %189 {strides = array<i32>} : memref<8x8x128xbf16, #tpu.memory_space<vmem>>, vector<1x8x128xbf16>,
    %c6_i32 = arith.constant 6 : i32
    %190 = arith.index_cast %c6_i32 : i32 to index
    %c0_69 = arith.constant 0 : index
    %c0_70 = arith.constant 0 : index
    %191 = vector.load %arg12[%190, %c0_69, %c0_70] : memref<8x8x512xf32, #tpu.memory_space<vmem>>, vector<1x8x512xf32>
    %192 = vector.shape_cast %191 : vector<1x8x512xf32> to vector<8x512xf32>
    %193 = arith.truncf %184 : vector<8x128xf32> to vector<8x128xbf16>
    %c0_71 = arith.constant 0 : index
    %c0_72 = arith.constant 0 : index
    %194 = vector.load %arg5[%c0_71, %c0_72] : memref<128x512xbf16, #tpu.memory_space<vmem>>, vector<128x512xbf16>
    %cst_73 = arith.constant dense<0.000000e+00> : vector<8x512xf32>
    %195 = tpu.matmul %193, %194, %cst_73 {dimension_numbers = #tpu.dot_dimension_numbers<[1], [0], [0], [1], [0, 0, 1, 1], [], []>} : vector<8x128xbf16>, vector<128x512xbf16>, vector<8x512xf32> -> vector<8x512xf32>
    %196 = arith.addf %192, %195 : vector<8x512xf32>
    %197 = vector.extract_strided_slice %196 {offsets = [0, 0], sizes = [8, 384], strides = [1, 1]} : vector<8x512xf32> to vector<8x384xf32>
    %198 = arith.negf %197 : vector<8x384xf32>
    %199 = math.exp %198 : vector<8x384xf32>
    %cst_74 = arith.constant 1.000000e+00 : f32
    %200 = vector.broadcast %cst_74 : f32 to vector<8x384xf32>
    %201 = arith.addf %200, %199 : vector<8x384xf32>
    %202 = arith.divf %200, %201 : vector<8x384xf32>
    %203 = vector.extract_strided_slice %196 {offsets = [0, 384], sizes = [8, 128], strides = [1, 1]} : vector<8x512xf32> to vector<8x128xf32>
    %204 = math.tanh %203 : vector<8x128xf32>
    %205 = vector.extract_strided_slice %202 {offsets = [0, 0], sizes = [8, 128], strides = [1, 1]} : vector<8x384xf32> to vector<8x128xf32>
    %206 = vector.extract_strided_slice %202 {offsets = [0, 128], sizes = [8, 128], strides = [1, 1]} : vector<8x384xf32> to vector<8x128xf32>
    %207 = vector.extract_strided_slice %202 {offsets = [0, 256], sizes = [8, 128], strides = [1, 1]} : vector<8x384xf32> to vector<8x128xf32>
    %208 = arith.mulf %206, %182 : vector<8x128xf32>
    %209 = arith.mulf %205, %204 : vector<8x128xf32>
    %210 = arith.addf %208, %209 : vector<8x128xf32>
    %211 = math.tanh %210 : vector<8x128xf32>
    %212 = arith.mulf %207, %211 : vector<8x128xf32>
    %213 = arith.truncf %212 : vector<8x128xf32> to vector<8x128xbf16>
    %214 = arith.index_cast %c6_i32 : i32 to index
    %c0_75 = arith.constant 0 : index
    %c0_76 = arith.constant 0 : index
    %215 = vector.load %arg13[%214, %c0_75, %c0_76] : memref<8x8x128xbf16, #tpu.memory_space<vmem>>, vector<1x8x128xbf16>
    %216 = vector.shape_cast %215 : vector<1x8x128xbf16> to vector<8x128xbf16>
    %217 = vector.shape_cast %213 : vector<8x128xbf16> to vector<1x8x128xbf16>
    tpu.vector_store %arg13[%214, %c0_75, %c0_76], %217 {strides = array<i32>} : memref<8x8x128xbf16, #tpu.memory_space<vmem>>, vector<1x8x128xbf16>,
    %c7_i32 = arith.constant 7 : i32
    %218 = arith.index_cast %c7_i32 : i32 to index
    %c0_77 = arith.constant 0 : index
    %c0_78 = arith.constant 0 : index
    %219 = vector.load %arg12[%218, %c0_77, %c0_78] : memref<8x8x512xf32, #tpu.memory_space<vmem>>, vector<1x8x512xf32>
    %220 = vector.shape_cast %219 : vector<1x8x512xf32> to vector<8x512xf32>
    %221 = arith.truncf %212 : vector<8x128xf32> to vector<8x128xbf16>
    %c0_79 = arith.constant 0 : index
    %c0_80 = arith.constant 0 : index
    %222 = vector.load %arg5[%c0_79, %c0_80] : memref<128x512xbf16, #tpu.memory_space<vmem>>, vector<128x512xbf16>
    %cst_81 = arith.constant dense<0.000000e+00> : vector<8x512xf32>
    %223 = tpu.matmul %221, %222, %cst_81 {dimension_numbers = #tpu.dot_dimension_numbers<[1], [0], [0], [1], [0, 0, 1, 1], [], []>} : vector<8x128xbf16>, vector<128x512xbf16>, vector<8x512xf32> -> vector<8x512xf32>
    %224 = arith.addf %220, %223 : vector<8x512xf32>
    %225 = vector.extract_strided_slice %224 {offsets = [0, 0], sizes = [8, 384], strides = [1, 1]} : vector<8x512xf32> to vector<8x384xf32>
    %226 = arith.negf %225 : vector<8x384xf32>
    %227 = math.exp %226 : vector<8x384xf32>
    %cst_82 = arith.constant 1.000000e+00 : f32
    %228 = vector.broadcast %cst_82 : f32 to vector<8x384xf32>
    %229 = arith.addf %228, %227 : vector<8x384xf32>
    %230 = arith.divf %228, %229 : vector<8x384xf32>
    %231 = vector.extract_strided_slice %224 {offsets = [0, 384], sizes = [8, 128], strides = [1, 1]} : vector<8x512xf32> to vector<8x128xf32>
    %232 = math.tanh %231 : vector<8x128xf32>
    %233 = vector.extract_strided_slice %230 {offsets = [0, 0], sizes = [8, 128], strides = [1, 1]} : vector<8x384xf32> to vector<8x128xf32>
    %234 = vector.extract_strided_slice %230 {offsets = [0, 128], sizes = [8, 128], strides = [1, 1]} : vector<8x384xf32> to vector<8x128xf32>
    %235 = vector.extract_strided_slice %230 {offsets = [0, 256], sizes = [8, 128], strides = [1, 1]} : vector<8x384xf32> to vector<8x128xf32>
    %236 = arith.mulf %234, %210 : vector<8x128xf32>
    %237 = arith.mulf %233, %232 : vector<8x128xf32>
    %238 = arith.addf %236, %237 : vector<8x128xf32>
    %239 = math.tanh %238 : vector<8x128xf32>
    %240 = arith.mulf %235, %239 : vector<8x128xf32>
    %241 = arith.truncf %240 : vector<8x128xf32> to vector<8x128xbf16>
    %242 = arith.index_cast %c7_i32 : i32 to index
    %c0_83 = arith.constant 0 : index
    %c0_84 = arith.constant 0 : index
    %243 = vector.load %arg13[%242, %c0_83, %c0_84] : memref<8x8x128xbf16, #tpu.memory_space<vmem>>, vector<1x8x128xbf16>
    %244 = vector.shape_cast %243 : vector<1x8x128xbf16> to vector<8x128xbf16>
    %245 = vector.shape_cast %241 : vector<8x128xbf16> to vector<1x8x128xbf16>
    tpu.vector_store %arg13[%242, %c0_83, %c0_84], %245 {strides = array<i32>} : memref<8x8x128xbf16, #tpu.memory_space<vmem>>, vector<1x8x128xbf16>,
    %c8_i32 = arith.constant 8 : i32
    %c0_85 = arith.constant 0 : index
    %c0_86 = arith.constant 0 : index
    %246 = vector.load %arg10[%c0_85, %c0_86] : memref<8x128xf32, #tpu.memory_space<vmem>>, vector<8x128xf32>
    tpu.vector_store %arg10[%c0_85, %c0_86], %240 {strides = array<i32>} : memref<8x128xf32, #tpu.memory_space<vmem>>, vector<8x128xf32>,
    %c0_87 = arith.constant 0 : index
    %c0_88 = arith.constant 0 : index
    %247 = vector.load %arg11[%c0_87, %c0_88] : memref<8x128xf32, #tpu.memory_space<vmem>>, vector<8x128xf32>
    tpu.vector_store %arg11[%c0_87, %c0_88], %238 {strides = array<i32>} : memref<8x128xf32, #tpu.memory_space<vmem>>, vector<8x128xf32>,
    %c0_89 = arith.constant 0 : index
    %c0_90 = arith.constant 0 : index
    %c0_91 = arith.constant 0 : index
    %248 = vector.load %arg13[%c0_89, %c0_90, %c0_91] : memref<8x8x128xbf16, #tpu.memory_space<vmem>>, vector<8x8x128xbf16>
    %249 = vector.shape_cast %248 : vector<8x8x128xbf16> to vector<64x128xbf16>
    %c0_92 = arith.constant 0 : index
    %c0_93 = arith.constant 0 : index
    %250 = vector.load %arg7[%c0_92, %c0_93] : memref<128x128xbf16, #tpu.memory_space<vmem>>, vector<128x128xbf16>
    %cst_94 = arith.constant dense<0.000000e+00> : vector<64x128xf32>
    %251 = tpu.matmul %249, %250, %cst_94 {dimension_numbers = #tpu.dot_dimension_numbers<[1], [0], [0], [1], [0, 0, 1, 1], [], []>} : vector<64x128xbf16>, vector<128x128xbf16>, vector<64x128xf32> -> vector<64x128xf32>
    %c0_95 = arith.constant 0 : index
    %c0_96 = arith.constant 0 : index
    %252 = vector.load %arg8[%c0_95, %c0_96] : memref<1x128xf32, #tpu.memory_space<vmem>>, vector<1x128xf32>
    %253 = vector.broadcast %252 : vector<1x128xf32> to vector<64x128xf32>
    %254 = arith.addf %251, %253 : vector<64x128xf32>
    %255 = vector.shape_cast %254 : vector<64x128xf32> to vector<8x8x128xf32>
    %256 = arith.truncf %255 : vector<8x8x128xf32> to vector<8x8x128xbf16>
    %c0_97 = arith.constant 0 : index
    %c0_98 = arith.constant 0 : index
    %c0_99 = arith.constant 0 : index
    %257 = vector.load %arg9[%c0_97, %c0_98, %c0_99] : memref<8x8x128xbf16, #tpu.memory_space<vmem>>, vector<8x8x128xbf16>
    tpu.vector_store %arg9[%c0_97, %c0_98, %c0_99], %256 {strides = array<i32>} : memref<8x8x128xbf16, #tpu.memory_space<vmem>>, vector<8x8x128xbf16>,
    return
  }
  func.func @transform_0(%arg0: i32) -> (i32, i32, i32) {
    %c0_i32 = arith.constant 0 : i32
    %c0_i32_0 = arith.constant 0 : i32
    %c0_i32_1 = arith.constant 0 : i32
    return %arg0, %c0_i32, %c0_i32_0 : i32, i32, i32
  }
  func.func @transform_1(%arg0: i32) -> (i32, i32) {
    %c0_i32 = arith.constant 0 : i32
    %c0_i32_0 = arith.constant 0 : i32
    %c0_i32_1 = arith.constant 0 : i32
    return %c0_i32, %c0_i32_0 : i32, i32
  }
  func.func @transform_2(%arg0: i32) -> (i32, i32) {
    %c0_i32 = arith.constant 0 : i32
    %c0_i32_0 = arith.constant 0 : i32
    %c0_i32_1 = arith.constant 0 : i32
    return %c0_i32, %c0_i32_0 : i32, i32
  }
  func.func @transform_3(%arg0: i32) -> (i32, i32) {
    %c0_i32 = arith.constant 0 : i32
    %c0_i32_0 = arith.constant 0 : i32
    %c0_i32_1 = arith.constant 0 : i32
    return %c0_i32, %c0_i32_0 : i32, i32
  }
  func.func @transform_4(%arg0: i32) -> (i32, i32) {
    %c0_i32 = arith.constant 0 : i32
    %c0_i32_0 = arith.constant 0 : i32
    %c0_i32_1 = arith.constant 0 : i32
    return %c0_i32, %c0_i32_0 : i32, i32
  }
  func.func @transform_5(%arg0: i32) -> (i32, i32) {
    %c0_i32 = arith.constant 0 : i32
    %c0_i32_0 = arith.constant 0 : i32
    %c0_i32_1 = arith.constant 0 : i32
    return %c0_i32, %c0_i32_0 : i32, i32
  }
  func.func @transform_6(%arg0: i32) -> (i32, i32) {
    %c0_i32 = arith.constant 0 : i32
    %c0_i32_0 = arith.constant 0 : i32
    %c0_i32_1 = arith.constant 0 : i32
    return %c0_i32, %c0_i32_0 : i32, i32
  }
  func.func @transform_7(%arg0: i32) -> (i32, i32) {
    %c0_i32 = arith.constant 0 : i32
    %c0_i32_0 = arith.constant 0 : i32
    %c0_i32_1 = arith.constant 0 : i32
    return %c0_i32, %c0_i32_0 : i32, i32
  }
  func.func @transform_8(%arg0: i32) -> (i32, i32, i32) {
    %c0_i32 = arith.constant 0 : i32
    %c0_i32_0 = arith.constant 0 : i32
    %c0_i32_1 = arith.constant 0 : i32
    return %arg0, %c0_i32, %c0_i32_0 : i32, i32, i32
  }
}

</mosaic_0001>

<bundles_post_ra>
// kernel: tpu_custom_call.1
= control target key start
LH: loop header
LB: loop body
LE: loop exit
PB: predicated region body
PF: predicated region fallthrough
CT: control target
= control target key end

     0   :  { %13 = vsyncpa [#allocation7], 0  ;;  %s4926_s0 = inlined_call_operand.hbm [shape: bf16[8,8,128], index: 0, kind: input, shape index: {}]   ;;  %s4927_s1 = inlined_call_operand.hbm [shape: bf16[128,128], index: 1, kind: input, shape index: {}]   ;;  %s4928_s2 = inlined_call_operand.vmem [shape: f32[1,128], index: 2, kind: input, shape index: {}]   ;;  %s4929_s3 = inlined_call_operand.hbm [shape: bf16[128,512], index: 3, kind: input, shape index: {}]   ;;  %s4930_s4 = inlined_call_operand.hbm [shape: bf16[128,512], index: 4, kind: input, shape index: {}]   ;;  %s4931_s5 = inlined_call_operand.vmem [shape: f32[1,512], index: 5, kind: input, shape index: {}]   ;;  %s4932_s6 = inlined_call_operand.hbm [shape: bf16[128,128], index: 6, kind: input, shape index: {}]   ;;  %s4933_s7 = inlined_call_operand.vmem [shape: f32[1,128], index: 7, kind: input, shape index: {}]   ;;  %s4934_s8 = inlined_call_operand.hbm [shape: bf16[8,8,128], index: 8, kind: output, shape index: {}]  }
   0x1   :  { %14 = vsyncpa [#allocation10], 0 }
   0x2   :  { %15 = vsyncpa [#allocation13], 0 }
   0x3   :  { %16 = vsyncpa [#allocation8], 0  ;;  %s4244_s27 = smov [#allocation9]   ;;  %s4104_s9 = scalar_lea.hbm %s4927_s1, 1024 }
   0x4   :  { %s34_s28 = sshll.u32 %s4244_s27, 4  ;;  %p4105_p0 = scmp.ne.s32.totalorder %s4927_s1, %s4104_s9  ;;  %s35_s28 = int_to_ptr.vmem [resolvable:$true] %s34_s28 }
   0x5   :  { %p4108_p1 = scmp.lt.u32.totalorder %s4104_s9, %s4927_s1 }
   0x7   :  { %p4110_p2 = pnand %p4108_p1, %p4105_p0 }
   0x9   :  { %4113 = shalt.err (!%p4110_p2)
}
   0xa   :  { %s4114_s14 = scalar_lea.vmem %s35_s28, 1024  ;;  %p4119_p4 = scmp.lt.s32.totalorder %s35_s28, %s35_s28 }
   0xb   :  { %p4115_p3 = scmp.ne.s32.totalorder %s35_s28, %s4114_s14  ;;  %p4120_p5 = scmp.lt.s32.totalorder %s4114_s14, %s4114_s14 }
   0xd   :  { %p4121_p6 = por %p4120_p5, %p4119_p4 }
   0xf   :  { %p4122_p7 = pnand %p4121_p6, %p4115_p3 }
  0x11   :  { %4125 = shalt.err (!%p4122_p7)
}
  0x12   :  { %s4245_s15 = smov 64   ;;  %s4246_s16 = smov 4  }
  0x13   :  { %40 = dma.hbm_to_vmem [thread:$0]  %s4927_s1, 1024, %s35_s28, [#allocation10], %s4245_s15, %s4245_s15, %s4246_s16  }
  0x14   :  { %s4247_s19 = smov [#allocation12]   ;;  %s4248_s21 = smov [#allocation6]  }
  0x15   :  { %s60_s20 = sshll.u32 %s4247_s19, 4  ;;  %s22_s22 = sshll.u32 %s4248_s21, 4  ;;  %s61_s20 = int_to_ptr.vmem [resolvable:$true] %s60_s20  ;;  %s23_s22 = int_to_ptr.vmem [resolvable:$true] %s22_s22 }
  0x16   :  { %s4126_s25 = scalar_lea.hbm %s4930_s4, 4096 }
  0x17   :  { %p4127_p8 = scmp.ne.s32.totalorder %s4930_s4, %s4126_s25  ;;  %p4130_p9 = scmp.lt.u32.totalorder %s4126_s25, %s4930_s4 }
  0x19   :  { %p4132_p10 = pnand %p4130_p9, %p4127_p8 }
  0x1b   :  { %4135 = shalt.err (!%p4132_p10)
}
  0x1c   :  { %s4136_s1 = scalar_lea.vmem %s61_s20, 4096  ;;  %p4141_p12 = scmp.lt.s32.totalorder %s61_s20, %s61_s20 }
  0x1d   :  { %p4137_p11 = scmp.ne.s32.totalorder %s61_s20, %s4136_s1  ;;  %p4142_p13 = scmp.lt.s32.totalorder %s4136_s1, %s4136_s1 }
  0x1f   :  { %p4143_p0 = por %p4142_p13, %p4141_p12 }
  0x21   :  { %p4144_p1 = pnand %p4143_p0, %p4137_p11 }
  0x23   :  { %4147 = shalt.err (!%p4144_p1)
}
  0x24   :  { %s4249_s28 = smov 256   ;;  %s4250_s9 = smov 16  }
  0x25   :  { %66 = dma.hbm_to_vmem [thread:$0]  %s4930_s4, 4096, %s61_s20, [#allocation13], %s4249_s28, %s4249_s28, %s4250_s9  }
  0x26   :  { %s4148_s14 = scalar_lea.hbm %s4926_s0, 512 }
  0x27   :  { %p4149_p2 = scmp.ne.s32.totalorder %s4926_s0, %s4148_s14  ;;  %p4152_p3 = scmp.lt.u32.totalorder %s4148_s14, %s4926_s0 }
  0x29   :  { %p4154_p4 = pnand %p4152_p3, %p4149_p2 }
  0x2b   :  { %4157 = shalt.err (!%p4154_p4)
}
  0x2c   :  { %s4158_s23 = scalar_lea.vmem %s23_s22, 512  ;;  %p4163_p6 = scmp.lt.s32.totalorder %s23_s22, %s23_s22 }
  0x2d   :  { %p4159_p5 = scmp.ne.s32.totalorder %s23_s22, %s4158_s23  ;;  %p4164_p7 = scmp.lt.s32.totalorder %s4158_s23, %s4158_s23 }
  0x2f   :  { %p4165_p8 = por %p4164_p7, %p4163_p6 }
  0x31   :  { %p4166_p9 = pnand %p4165_p8, %p4159_p5 }
  0x33   :  { %4169 = shalt.err (!%p4166_p9)
}
  0x34   :  { %28 = dma.hbm_to_vmem [thread:$0]  %s4926_s0, 512, %s23_s22, [#allocation7], %s4245_s15, %s4245_s15, %s4246_s16  }
  0x35   :  { %s4251_s24 = smov [#allocation11]   ;;  %s4252_s26 = smov [#allocation14]  }
  0x36   :  { %s48_s25 = sshll.u32 %s4251_s24, 4  ;;  %s74_s27 = sshll.u32 %s4252_s26, 4  ;;  %s49_s25 = int_to_ptr.vmem [resolvable:$true] %s48_s25  ;;  %s75_s27 = int_to_ptr.vmem [resolvable:$true] %s74_s27 }
  0x37   :  { %s4170_s1 = scalar_lea.hbm %s4929_s3, 4096 }
  0x38   :  { %p4171_p10 = scmp.ne.s32.totalorder %s4929_s3, %s4170_s1  ;;  %p4174_p11 = scmp.lt.u32.totalorder %s4170_s1, %s4929_s3 }
  0x3a   :  { %p4176_p12 = pnand %p4174_p11, %p4171_p10 }
  0x3c   :  { %4179 = shalt.err (!%p4176_p12)
}
  0x3d   :  { %s4180_s0 = scalar_lea.vmem %s49_s25, 4096  ;;  %p4185_p0 = scmp.lt.s32.totalorder %s49_s25, %s49_s25 }
  0x3e   :  { %p4181_p13 = scmp.ne.s32.totalorder %s49_s25, %s4180_s0  ;;  %p4186_p1 = scmp.lt.s32.totalorder %s4180_s0, %s4180_s0 }
  0x40   :  { %p4187_p2 = por %p4186_p1, %p4185_p0 }
  0x42   :  { %p4188_p3 = pnand %p4187_p2, %p4181_p13 }
  0x44   :  { %4191 = shalt.err (!%p4188_p3)
}
  0x45   :  { %54 = dma.hbm_to_vmem [thread:$0]  %s4929_s3, 4096, %s49_s25, [#allocation10], %s4249_s28, %s4249_s28, %s4250_s9  }
  0x46   :  { %s4192_s19 = scalar_lea.hbm %s4932_s6, 1024 }
  0x47   :  { %p4193_p4 = scmp.ne.s32.totalorder %s4932_s6, %s4192_s19  ;;  %p4196_p5 = scmp.lt.u32.totalorder %s4192_s19, %s4932_s6 }
  0x49   :  { %p4198_p6 = pnand %p4196_p5, %p4193_p4 }
  0x4b   :  { %4201 = shalt.err (!%p4198_p6)
}
  0x4c   :  { %s4202_s24 = scalar_lea.vmem %s75_s27, 1024  ;;  %p4207_p8 = scmp.lt.s32.totalorder %s75_s27, %s75_s27 }
  0x4d   :  { %p4203_p7 = scmp.ne.s32.totalorder %s75_s27, %s4202_s24  ;;  %p4208_p9 = scmp.lt.s32.totalorder %s4202_s24, %s4202_s24 }
  0x4f   :  { %p4209_p10 = por %p4208_p9, %p4207_p8 }
  0x51   :  { %p4210_p11 = pnand %p4209_p10, %p4203_p7 }
  0x53   :  { %4213 = shalt.err (!%p4210_p11)
}
  0x54   :  { %80 = dma.hbm_to_vmem [thread:$0]  %s4932_s6, 1024, %s75_s27, [#allocation13], %s4245_s15, %s4245_s15, %s4246_s16  }
  0x55   :  { %4236 = dma.done.wait [#allocation7], 512  }
  0x56   :  { %4237 = vsyncadd [#allocation7], 4294966784 }
  0x57   :  { %4238 = dma.done.wait [#allocation10], 5120  }
  0x58   :  { %4239 = vsyncadd [#allocation10], 4294962176 }
  0x59   :  { %4240 = dma.done.wait [#allocation13], 5120  }
  0x5a   :  { %4241 = vsyncadd [#allocation13], 4294962176  ;;  %v3808_v0 = vld [vmem:[#allocation9] sm:$0xff]   ;;  %v3809_v1 = vld [vmem:[#allocation9 + $0x8] sm:$0xff]   ;;  %v4935_v45 = vmov 0  }
  0x5b   :  { %3748 = vmatprep.subr.bf16.mxu0 %v3808_v0  ;;  %v3810_v2 = vld [vmem:[#allocation9 + $0x10] sm:$0xff]   ;;  %v3811_v3 = vld [vmem:[#allocation9 + $0x18] sm:$0xff]   ;;  %v3816_v4 = vld [vmem:[#allocation6] sm:$0xff]   ;;  %531 = vmatprep.mubr.bf16.mxu1 %v4935_v45 }
  0x5c   :  { %3749 = vmatpush3.bf16.msra.mxu0 %v3808_v0  ;;  %3764 = vmatprep.mubr.bf16.mxu0 %v3816_v4  ;;  %v3812_v5 = vld [vmem:[#allocation9 + $0x20] sm:$0xff]   ;;  %v3813_v10 = vld [vmem:[#allocation9 + $0x28] sm:$0xff]   ;;  %v3814_v12 = vld [vmem:[#allocation9 + $0x30] sm:$0xff]  }
  0x5d   :  { %3750 = vmatprep.subr.bf16.mxu0 %v3809_v1  ;;  %v3820_v6 = vld [vmem:[#allocation11 + $0x4] ss:$16 sps:$4 sm:$0xff]   ;;  %v3822_v7 = vld [vmem:[#allocation11] ss:$16 sps:$4 sm:$0xff]   ;;  %v3815_v15 = vld [vmem:[#allocation9 + $0x38] sm:$0xff]  }
  0x5e   :  { %499 = vmatprep.subr.bf16.mxu1 %v3820_v6  ;;  %v3826_v8 = vld [vmem:[#allocation11 + $0x24] ss:$16 sps:$4 sm:$0xff]   ;;  %v3828_v9 = vld [vmem:[#allocation11 + $0x20] ss:$16 sps:$4 sm:$0xff]   ;;  %v3825_v18 = vld [vmem:[#allocation11 + $0xc] ss:$16 sps:$4 sm:$0xff]  }
  0x5f   :  { %500 = vmatpush1.bf16.msra.mxu1 %v3822_v7  ;;  %v3832_v11 = vld [vmem:[#allocation11 + $0x44] ss:$16 sps:$4 sm:$0xff]   ;;  %v3834_v13 = vld [vmem:[#allocation11 + $0x40] ss:$16 sps:$4 sm:$0xff]   ;;  %v3817_v21 = vld [vmem:[#allocation6 + $0x8] sm:$0xff]  }
  0x60   :  { %3751 = vmatpush3.bf16.msra.mxu0 %v3809_v1  ;;  %501 = vmatprep.subr.bf16.mxu1 %v3826_v8  ;;  %v3838_v14 = vld [vmem:[#allocation11 + $0x64] ss:$16 sps:$4 sm:$0xff]   ;;  %v3840_v16 = vld [vmem:[#allocation11 + $0x60] ss:$16 sps:$4 sm:$0xff]   ;;  %v3823_v23 = vld [vmem:[#allocation11 + $0x8] ss:$16 sps:$4 sm:$0xff]  }
  0x61   :  { %3752 = vmatprep.subr.bf16.mxu0 %v3810_v2  ;;  %v3844_v17 = vld [vmem:[#allocation11 + $0x84] ss:$16 sps:$4 sm:$0xff]   ;;  %v3846_v19 = vld [vmem:[#allocation11 + $0x80] ss:$16 sps:$4 sm:$0xff]   ;;  %v3831_v24 = vld [vmem:[#allocation11 + $0x2c] ss:$16 sps:$4 sm:$0xff]  }
  0x62   :  { %v3850_v20 = vld [vmem:[#allocation11 + $0xa4] ss:$16 sps:$4 sm:$0xff]   ;;  %v3852_v25 = vld [vmem:[#allocation11 + $0xa0] ss:$16 sps:$4 sm:$0xff]   ;;  %v3829_v26 = vld [vmem:[#allocation11 + $0x28] ss:$16 sps:$4 sm:$0xff]  }
  0x63   :  { %502 = vmatpush1.bf16.msra.mxu1 %v3828_v9  ;;  %v3818_v22 = vld [vmem:[#allocation6 + $0x10] sm:$0xff]   ;;  %v3837_v27 = vld [vmem:[#allocation11 + $0x4c] ss:$16 sps:$4 sm:$0xff]   ;;  %v3835_v29 = vld [vmem:[#allocation11 + $0x48] ss:$16 sps:$4 sm:$0xff]  }
  0x64   :  { %3753 = vmatpush3.bf16.msra.mxu0 %v3810_v2  ;;  %503 = vmatprep.subr.bf16.mxu1 %v3832_v11  ;;  %v3819_v28 = vld [vmem:[#allocation6 + $0x18] sm:$0xff]   ;;  %v3856_v36 = vld [vmem:[#allocation11 + $0xc4] ss:$16 sps:$4 sm:$0xff]   ;;  %v3858_v38 = vld [vmem:[#allocation11 + $0xc0] ss:$16 sps:$4 sm:$0xff]  }
  0x65   :  { %3754 = vmatprep.subr.bf16.mxu0 %v3811_v3  ;;  %v3843_v30 = vld [vmem:[#allocation11 + $0x6c] ss:$16 sps:$4 sm:$0xff]   ;;  %v3841_v31 = vld [vmem:[#allocation11 + $0x68] ss:$16 sps:$4 sm:$0xff]   ;;  %v3862_v40 = vld [vmem:[#allocation11 + $0xe4] ss:$16 sps:$4 sm:$0xff]  }
  0x66   :  { %v3849_v32 = vld [vmem:[#allocation11 + $0x8c] ss:$16 sps:$4 sm:$0xff]   ;;  %v3847_v33 = vld [vmem:[#allocation11 + $0x88] ss:$16 sps:$4 sm:$0xff]   ;;  %v3864_v42 = vld [vmem:[#allocation11 + $0xe0] ss:$16 sps:$4 sm:$0xff]  }
  0x67   :  { %504 = vmatpush1.bf16.msra.mxu1 %v3834_v13  ;;  %v3855_v34 = vld [vmem:[#allocation11 + $0xac] ss:$16 sps:$4 sm:$0xff]   ;;  %v3853_v35 = vld [vmem:[#allocation11 + $0xa8] ss:$16 sps:$4 sm:$0xff]   ;;  %v4376_v44 = vld [vmem:[#allocation12 + $0x4] ss:$16 sps:$4 sm:$0xff]  }
  0x68   :  { %3755 = vmatpush3.bf16.msra.mxu0 %v3811_v3  ;;  %505 = vmatprep.subr.bf16.mxu1 %v3838_v14  ;;  %v3861_v37 = vld [vmem:[#allocation11 + $0xcc] ss:$16 sps:$4 sm:$0xff]   ;;  %v3859_v39 = vld [vmem:[#allocation11 + $0xc8] ss:$16 sps:$4 sm:$0xff]   ;;  %v3363_v47 = vld [vmem:[%s4928_s2] ss:$0 sm:$0xff] }
  0x69   :  { %3756 = vmatprep.subr.bf16.mxu0 %v3812_v5  ;;  %v3867_v41 = vld [vmem:[#allocation11 + $0xec] ss:$16 sps:$4 sm:$0xff]   ;;  %v3865_v43 = vld [vmem:[#allocation11 + $0xe8] ss:$16 sps:$4 sm:$0xff]   ;;  %v4387_v61 = vld [vmem:[#allocation12] ss:$16 sps:$4 sm:$0xff]  }
  0x6a   :  { %v4380_v46 = vld [vmem:[#allocation12 + $0xc] ss:$16 sps:$4 sm:$0xff]   ;;  %v4389_v62 = vld [vmem:[#allocation12 + $0x8] ss:$16 sps:$4 sm:$0xff]   ;;  %v4391_v1 = vld [vmem:[#allocation12 + $0x24] ss:$16 sps:$4 sm:$0xff]  }
  0x6b   :  { %506 = vmatpush1.bf16.msra.mxu1 %v3840_v16  ;;  %v4393_v2 = vld [vmem:[#allocation12 + $0x2c] ss:$16 sps:$4 sm:$0xff]   ;;  %v4397_v8 = vld [vmem:[#allocation12 + $0x20] ss:$16 sps:$4 sm:$0xff]   ;;  %v4399_v9 = vld [vmem:[#allocation12 + $0x28] ss:$16 sps:$4 sm:$0xff]  }
  0x6c   :  { %3757 = vmatpush3.bf16.msra.mxu0 %v3812_v5  ;;  %507 = vmatprep.subr.bf16.mxu1 %v3844_v17  ;;  %v4403_v14 = vld [vmem:[#allocation12 + $0x44] ss:$16 sps:$4 sm:$0xff]  }
  0x6d   :  { %3758 = vmatprep.subr.bf16.mxu0 %v3813_v10 }
  0x6f   :  { %508 = vmatpush1.bf16.msra.mxu1 %v3846_v19  ;;  %v4411_v19 = vld [vmem:[#allocation12 + $0x40] ss:$16 sps:$4 sm:$0xff]  }
  0x70   :  { %3759 = vmatpush3.bf16.msra.mxu0 %v3813_v10  ;;  %509 = vmatprep.subr.bf16.mxu1 %v3850_v20  ;;  %v4413_v20 = vld [vmem:[#allocation12 + $0x48] ss:$16 sps:$4 sm:$0xff]  }
  0x71   :  { %3760 = vmatprep.subr.bf16.mxu0 %v3814_v12 }
  0x73   :  { %510 = vmatpush1.bf16.msra.mxu1 %v3852_v25  ;;  %v4425_v25 = vld [vmem:[#allocation12 + $0x68] ss:$16 sps:$4 sm:$0xff]  }
  0x74   :  { %3761 = vmatpush3.bf16.msra.mxu0 %v3814_v12  ;;  %511 = vmatprep.subr.bf16.mxu1 %v3856_v36  ;;  %v4463_v36 = vld [vmem:[#allocation12 + $0xc0] ss:$16 sps:$4 sm:$0xff]  }
  0x75   :  { %3762 = vmatprep.subr.bf16.mxu0 %v3815_v15 }
  0x77   :  { %512 = vmatpush1.bf16.msra.mxu1 %v3858_v38  ;;  %v4469_v38 = vld [vmem:[#allocation12 + $0xe4] ss:$16 sps:$4 sm:$0xff]  }
  0x78   :  { %3763 = vmatpush3.bf16.msra.mxu0 %v3815_v15  ;;  %513 = vmatprep.subr.bf16.mxu1 %v3862_v40  ;;  %v4405_v15 = vld [vmem:[#allocation12 + $0x4c] ss:$16 sps:$4 sm:$0xff]   ;;  %v4475_v40 = vld [vmem:[#allocation12 + $0xe0] ss:$16 sps:$4 sm:$0xff]  }
  0x79   :  { %572 = vmatprep.subr.bf16.mxu0 %v3825_v18 }
  0x7b   :  { %3765 = vmatmul.mubr.bf16.vlgmr.msra.gmra.mrb[0].mxu0 %v3817_v21  ;;  %514 = vmatpush1.bf16.msra.mxu1 %v3864_v42  ;;  %v4254_v42 = vmov 0.0|0.0  }
  0x7c   :  { %3768 = vmatprep.mubr.bf16.mxu0 %v3818_v22  ;;  %573 = vmatpush1.bf16.msra.mxu0 %v3823_v23  ;;  %v4417_v22 = vld [vmem:[#allocation12 + $0x64] ss:$16 sps:$4 sm:$0xff]   ;;  %v4419_v23 = vld [vmem:[#allocation12 + $0x6c] ss:$16 sps:$4 sm:$0xff]  }
  0x7d   :  { %574 = vmatprep.subr.bf16.mxu0 %v3831_v24  ;;  %876 = vmatprep.subr.bf16.mxu1 %v4376_v44  ;;  %v4423_v24 = vld [vmem:[#allocation12 + $0x60] ss:$16 sps:$4 sm:$0xff]  }
  0x80   :  { %575 = vmatpush1.bf16.msra.mxu0 %v3829_v26  ;;  %v4429_v26 = vld [vmem:[#allocation12 + $0x84] ss:$16 sps:$4 sm:$0xff]  }
  0x81   :  { %576 = vmatprep.subr.bf16.mxu0 %v3837_v27  ;;  %v4431_v27 = vld [vmem:[#allocation12 + $0x8c] ss:$16 sps:$4 sm:$0xff]  }
  0x83   :  { %3769 = vmatmul.mubr.bf16.gmra.mrb[4].mxu0 %v3819_v28  ;;  %v4437_v28 = vld [vmem:[#allocation12 + $0x80] ss:$16 sps:$4 sm:$0xff]  }
  0x84   :  { %577 = vmatpush1.bf16.msra.mxu0 %v3835_v29  ;;  %604 = vmatprep.mubr.bf16.mxu0 %v4935_v45  ;;  %v4439_v29 = vld [vmem:[#allocation12 + $0x88] ss:$16 sps:$4 sm:$0xff]  }
  0x85   :  { %578 = vmatprep.subr.bf16.mxu0 %v3843_v30  ;;  %v4443_v30 = vld [vmem:[#allocation12 + $0xa4] ss:$16 sps:$4 sm:$0xff]  }
  0x88   :  { %579 = vmatpush1.bf16.msra.mxu0 %v3841_v31  ;;  %v4445_v31 = vld [vmem:[#allocation12 + $0xac] ss:$16 sps:$4 sm:$0xff]  }
  0x89   :  { %580 = vmatprep.subr.bf16.mxu0 %v3849_v32  ;;  %v4449_v32 = vld [vmem:[#allocation12 + $0xa0] ss:$16 sps:$4 sm:$0xff]  }
  0x8c   :  { %581 = vmatpush1.bf16.msra.mxu0 %v3847_v33  ;;  %v4451_v33 = vld [vmem:[#allocation12 + $0xa8] ss:$16 sps:$4 sm:$0xff]  }
  0x8d   :  { %582 = vmatprep.subr.bf16.mxu0 %v3855_v34  ;;  %v4455_v34 = vld [vmem:[#allocation12 + $0xc4] ss:$16 sps:$4 sm:$0xff]  }
  0x90   :  { %583 = vmatpush1.bf16.msra.mxu0 %v3853_v35  ;;  %v4457_v35 = vld [vmem:[#allocation12 + $0xcc] ss:$16 sps:$4 sm:$0xff]  }
  0x91   :  { %584 = vmatprep.subr.bf16.mxu0 %v3861_v37  ;;  %v4465_v37 = vld [vmem:[#allocation12 + $0xc8] ss:$16 sps:$4 sm:$0xff]  }
  0x94   :  { %585 = vmatpush1.bf16.msra.mxu0 %v3859_v39  ;;  %v4471_v39 = vld [vmem:[#allocation12 + $0xec] ss:$16 sps:$4 sm:$0xff]  }
  0x95   :  { %586 = vmatprep.subr.bf16.mxu0 %v3867_v41  ;;  %v4477_v41 = vld [vmem:[#allocation12 + $0xe8] ss:$16 sps:$4 sm:$0xff]  }
  0x98   :  { %587 = vmatpush1.bf16.msra.mxu0 %v3865_v43  ;;  %v319_v43 = vlaneseq }
  0x99   :  { %917 = vmatprep.subr.bf16.mxu0 %v4380_v46 }
 0x14e   :  { %v3766_v48 = vpop.f32.mrb[0].mxu0 }
 0x14f   :  { %v251_v49 = vadd.f32 %v3766_v48, %v3363_v47  ;;  %v242_v50 = vpop.f32.mrb[1].mxu0 }
 0x150   :  { %v243_v51 = vadd.f32 %v3363_v47, %v242_v50  ;;  %v3767_v52 = vpop.f32.mrb[2].mxu0  ;;  %v317_v50 = vld [vmem:[%s4931_s5] sm:$0xf] }
 0x151   :  { %v254_v53 = vadd.f32 %v3767_v52, %v3363_v47  ;;  %v245_v54 = vpop.f32.mrb[3].mxu0  ;;  %v275_v56 = vmax.f32 %v251_v49, 0.0 }
 0x152   :  { %v246_v55 = vadd.f32 %v3363_v47, %v245_v54  ;;  %v273_v58 = vmax.f32 %v243_v51, 0.0 }
 0x153   :  { %v276_v57 = vmax.f32 %v254_v53, 0.0 }
 0x154   :  { %v274_v59 = vmax.f32 %v246_v55, 0.0 }
 0x155   :  { %v282_v60 = vpack.c.bf16 %v276_v57, %v275_v56 }
 0x156   :  { %v281_v63 = vpack.c.bf16 %v274_v59, %v273_v58  ;;  %v3770_v0 = vpop.f32.mrb[4].mxu0 }
 0x157   :  { %v267_v3 = vadd.f32 %v3770_v0, %v3363_v47  ;;  %v258_v4 = vpop.f32.mrb[5].mxu0 }
 0x158   :  { %532 = vmatmul.mubr.bf16.vlgmr.msra.gmra.mrb[0].mxu1 %v281_v63  ;;  %605 = vmatmul.mubr.bf16.vlgmr.msra.gmra.mrb[8].mxu0 %v281_v63  ;;  %v259_v5 = vadd.f32 %v3363_v47, %v258_v4  ;;  %v3771_v6 = vpop.f32.mrb[6].mxu0 }
 0x159   :  { %877 = vmatpush1.bf16.msra.mxu1 %v4387_v61  ;;  %918 = vmatpush1.bf16.msra.mxu0 %v4389_v62  ;;  %v279_v7 = vmax.f32 %v267_v3, 0.0  ;;  %v270_v10 = vadd.f32 %v3771_v6, %v3363_v47  ;;  %v261_v11 = vpop.f32.mrb[7].mxu0 }
 0x15a   :  { %878 = vmatprep.subr.bf16.mxu1 %v4391_v1  ;;  %v277_v12 = vmax.f32 %v259_v5, 0.0  ;;  %919 = vmatprep.subr.bf16.mxu0 %v4393_v2  ;;  %v262_v13 = vadd.f32 %v3363_v47, %v261_v11  ;;  %v320_v47 = vshrl.u32 %v319_v43, 7 }
 0x15b   :  { %v280_v16 = vmax.f32 %v270_v10, 0.0  ;;  %541 = vmatprep.mubr.bf16.mxu1 %v4935_v45  ;;  %614 = vmatprep.mubr.bf16.mxu0 %v4935_v45 }
 0x15c   :  { %v278_v17 = vmax.f32 %v262_v13, 0.0  ;;  %v321_v48 = vsub.s32 0, %v320_v47  ;;  %v329_v49 = vsub.s32 2, %v320_v47  ;;  %v325_v51 = vsub.s32 1, %v320_v47 }
 0x15d   :  { %879 = vmatpush1.bf16.msra.mxu1 %v4397_v8  ;;  %v284_v18 = vpack.c.bf16 %v280_v16, %v279_v7  ;;  %920 = vmatpush1.bf16.msra.mxu0 %v4399_v9  ;;  %v333_v52 = vsub.s32 3, %v320_v47 }
 0x15e   :  { %v283_v21 = vpack.c.bf16 %v278_v17, %v277_v12  ;;  %880 = vmatprep.subr.bf16.mxu1 %v4403_v14  ;;  %921 = vmatprep.subr.bf16.mxu0 %v4405_v15  ;;  %v322_v55 = vrot.slane %v317_v50, %v321_v48  ;;  %v330_v56 = vrot.slane %v317_v50, %v329_v49 }
 0x15f   :  { %v326_v59 = vrot.slane %v317_v50, %v325_v51 }
 0x160   :  { %542 = vmatmul.mubr.bf16.gmra.mrb[4].mxu1 %v282_v60  ;;  %615 = vmatmul.mubr.bf16.gmra.mrb[12].mxu0 %v282_v60  ;;  %v334_v60 = vrot.slane %v317_v50, %v333_v52 }
 0x161   :  { %881 = vmatpush1.bf16.msra.mxu1 %v4411_v19  ;;  %922 = vmatpush1.bf16.msra.mxu0 %v4413_v20 }
 0x162   :  { %882 = vmatprep.subr.bf16.mxu1 %v4417_v22  ;;  %923 = vmatprep.subr.bf16.mxu0 %v4419_v23 }
 0x163   :  { %551 = vmatprep.mubr.bf16.mxu1 %v4935_v45  ;;  %624 = vmatprep.mubr.bf16.mxu0 %v4935_v45 }
 0x165   :  { %883 = vmatpush1.bf16.msra.mxu1 %v4423_v24  ;;  %924 = vmatpush1.bf16.msra.mxu0 %v4425_v25 }
 0x166   :  { %884 = vmatprep.subr.bf16.mxu1 %v4429_v26  ;;  %925 = vmatprep.subr.bf16.mxu0 %v4431_v27 }
 0x168   :  { %552 = vmatmul.mubr.bf16.gmra.mrb[8].mxu1 %v283_v21  ;;  %625 = vmatmul.mubr.bf16.gmra.mrb[16].mxu0 %v283_v21 }
 0x169   :  { %885 = vmatpush1.bf16.msra.mxu1 %v4437_v28  ;;  %926 = vmatpush1.bf16.msra.mxu0 %v4439_v29 }
 0x16a   :  { %886 = vmatprep.subr.bf16.mxu1 %v4443_v30  ;;  %927 = vmatprep.subr.bf16.mxu0 %v4445_v31 }
 0x16b   :  { %561 = vmatprep.mubr.bf16.mxu1 %v4935_v45  ;;  %634 = vmatprep.mubr.bf16.mxu0 %v4935_v45 }
 0x16d   :  { %887 = vmatpush1.bf16.msra.mxu1 %v4449_v32  ;;  %928 = vmatpush1.bf16.msra.mxu0 %v4451_v33 }
 0x16e   :  { %888 = vmatprep.subr.bf16.mxu1 %v4455_v34  ;;  %929 = vmatprep.subr.bf16.mxu0 %v4457_v35 }
 0x170   :  { %562 = vmatmul.mubr.bf16.gmra.mrb[12].mxu1 %v284_v18  ;;  %635 = vmatmul.mubr.bf16.gmra.mrb[20].mxu0 %v284_v18 }
 0x171   :  { %889 = vmatpush1.bf16.msra.mxu1 %v4463_v36  ;;  %930 = vmatpush1.bf16.msra.mxu0 %v4465_v37 }
 0x172   :  { %890 = vmatprep.subr.bf16.mxu1 %v4469_v38  ;;  %931 = vmatprep.subr.bf16.mxu0 %v4471_v39 }
 0x173   :  { %908 = vmatprep.mubr.bf16.mxu1 %v4935_v45  ;;  %949 = vmatprep.mubr.bf16.mxu0 %v4935_v45 }
 0x175   :  { %891 = vmatpush1.bf16.msra.mxu1 %v4475_v40  ;;  %932 = vmatpush1.bf16.msra.mxu0 %v4477_v41 }
 0x176   :  { %1185 = vmatprep.subr.bf16.mxu1 %v4376_v44  ;;  %1226 = vmatprep.subr.bf16.mxu0 %v4380_v46 }
 0x178   :  { %909 = vmatmul.mubr.bf16.vlgmr.msra.gmra.mrb[16].mxu1 %v4254_v42  ;;  %950 = vmatmul.mubr.bf16.vlgmr.msra.gmra.mrb[24].mxu0 %v4254_v42 }
 0x179   :  { %1186 = vmatpush1.bf16.msra.mxu1 %v4387_v61  ;;  %1227 = vmatpush1.bf16.msra.mxu0 %v4389_v62 }
 0x17a   :  { %1187 = vmatprep.subr.bf16.mxu1 %v4391_v1  ;;  %1228 = vmatprep.subr.bf16.mxu0 %v4393_v2 }
 0x17b   :  { %1217 = vmatprep.mubr.bf16.mxu1 %v4935_v45  ;;  %1258 = vmatprep.mubr.bf16.mxu0 %v4935_v45 }
 0x17d   :  { %1188 = vmatpush1.bf16.msra.mxu1 %v4397_v8  ;;  %1229 = vmatpush1.bf16.msra.mxu0 %v4399_v9 }
 0x17e   :  { %1189 = vmatprep.subr.bf16.mxu1 %v4403_v14  ;;  %1230 = vmatprep.subr.bf16.mxu0 %v4405_v15 }
 0x181   :  { %1190 = vmatpush1.bf16.msra.mxu1 %v4411_v19  ;;  %1231 = vmatpush1.bf16.msra.mxu0 %v4413_v20 }
 0x182   :  { %1191 = vmatprep.subr.bf16.mxu1 %v4417_v22  ;;  %1232 = vmatprep.subr.bf16.mxu0 %v4419_v23 }
 0x185   :  { %1192 = vmatpush1.bf16.msra.mxu1 %v4423_v24  ;;  %1233 = vmatpush1.bf16.msra.mxu0 %v4425_v25 }
 0x186   :  { %1193 = vmatprep.subr.bf16.mxu1 %v4429_v26  ;;  %1234 = vmatprep.subr.bf16.mxu0 %v4431_v27 }
 0x189   :  { %1194 = vmatpush1.bf16.msra.mxu1 %v4437_v28  ;;  %1235 = vmatpush1.bf16.msra.mxu0 %v4439_v29 }
 0x18a   :  { %1195 = vmatprep.subr.bf16.mxu1 %v4443_v30  ;;  %1236 = vmatprep.subr.bf16.mxu0 %v4445_v31 }
 0x18d   :  { %1196 = vmatpush1.bf16.msra.mxu1 %v4449_v32  ;;  %1237 = vmatpush1.bf16.msra.mxu0 %v4451_v33 }
 0x18e   :  { %1197 = vmatprep.subr.bf16.mxu1 %v4455_v34  ;;  %1238 = vmatprep.subr.bf16.mxu0 %v4457_v35 }
 0x191   :  { %1198 = vmatpush1.bf16.msra.mxu1 %v4463_v36  ;;  %1239 = vmatpush1.bf16.msra.mxu0 %v4465_v37 }
 0x192   :  { %1199 = vmatprep.subr.bf16.mxu1 %v4469_v38  ;;  %1240 = vmatprep.subr.bf16.mxu0 %v4471_v39 }
 0x195   :  { %1200 = vmatpush1.bf16.msra.mxu1 %v4475_v40  ;;  %1241 = vmatpush1.bf16.msra.mxu0 %v4477_v41 }
 0x196   :  { %1495 = vmatprep.subr.bf16.mxu1 %v4376_v44  ;;  %1536 = vmatprep.subr.bf16.mxu0 %v4380_v46 }
 0x22b   :  { %v4524_v53 = vpop.f32.mrb[0].mxu1  ;;  %v4526_v54 = vpop.f32.mrb[8].mxu0 }
 0x22c   :  { %v535_v57 = vpop.f32.mrb[1].mxu1  ;;  %v608_v58 = vpop.f32.mrb[9].mxu0 }
 0x22d   :  { %v537_v63 = vpop.f32.mrb[2].mxu1  ;;  %v610_v0 = vpop.f32.mrb[10].mxu0 }
 0x22e   :  { %v4528_v3 = vadd.f32 %v537_v63, %v322_v55  ;;  %v4530_v4 = vadd.f32 %v610_v0, %v330_v56  ;;  %v539_v5 = vpop.f32.mrb[3].mxu1  ;;  %v612_v6 = vpop.f32.mrb[11].mxu0 }
 0x22f   :  { %v4532_v7 = vadd.f32 %v539_v5, %v326_v59  ;;  %v4534_v10 = vadd.f32 %v612_v6, %v334_v60 }
 0x233   :  { %v543_v11 = vpop.f32.mrb[4].mxu1  ;;  %v616_v12 = vpop.f32.mrb[12].mxu0 }
 0x234   :  { %v4536_v13 = vadd.f32 %v543_v11, %v322_v55  ;;  %v4538_v16 = vadd.f32 %v616_v12, %v330_v56  ;;  %v545_v17 = vpop.f32.mrb[5].mxu1  ;;  %v618_v18 = vpop.f32.mrb[13].mxu0 }
 0x235   :  { %v4540_v21 = vadd.f32 %v545_v17, %v326_v59  ;;  %v4542_v42 = vadd.f32 %v618_v18, %v334_v60  ;;  %v547_v43 = vpop.f32.mrb[6].mxu1  ;;  %v620_v47 = vpop.f32.mrb[14].mxu0 }
 0x236   :  { %v4544_v48 = vadd.f32 %v547_v43, %v322_v55  ;;  %v4546_v49 = vadd.f32 %v620_v47, %v330_v56  ;;  %v549_v50 = vpop.f32.mrb[7].mxu1  ;;  %v622_v51 = vpop.f32.mrb[15].mxu0 }
 0x237   :  { %4937 = vst [vmem:[#allocation20_spill] sm:$0xff] %v4540_v21  ;;  %4938 = vst [vmem:[#allocation21_spill] sm:$0xff] %v4542_v42  ;;  %v4548_v52 = vadd.f32 %v549_v50, %v326_v59  ;;  %v4550_v63 = vadd.f32 %v622_v51, %v334_v60 }
 0x238   :  { %4939 = vst [vmem:[#allocation22_spill] sm:$0xff] %v4544_v48  ;;  %4940 = vst [vmem:[#allocation23_spill] sm:$0xff] %v4546_v49 }
 0x239   :  { %4941 = vst [vmem:[#allocation24_spill] sm:$0xff] %v4548_v52  ;;  %4942 = vst [vmem:[#allocation25_spill] sm:$0xff] %v4550_v63 }
 0x23b   :  { %v553_v0 = vpop.f32.mrb[8].mxu1  ;;  %v626_v5 = vpop.f32.mrb[16].mxu0 }
 0x23c   :  { %v4552_v6 = vadd.f32 %v553_v0, %v322_v55  ;;  %v4554_v11 = vadd.f32 %v626_v5, %v330_v56  ;;  %v555_v12 = vpop.f32.mrb[9].mxu1  ;;  %v628_v17 = vpop.f32.mrb[17].mxu0 }
 0x23d   :  { %v4556_v18 = vadd.f32 %v555_v12, %v326_v59  ;;  %v4558_v43 = vadd.f32 %v628_v17, %v334_v60  ;;  %v557_v47 = vpop.f32.mrb[10].mxu1  ;;  %v630_v45 = vpop.f32.mrb[18].mxu0 }
 0x23e   :  { %4943 = vst [vmem:[#allocation26_spill] sm:$0xff] %v4552_v6  ;;  %4944 = vst [vmem:[#allocation27_spill] sm:$0xff] %v4554_v11  ;;  %v4560_v49 = vadd.f32 %v557_v47, %v322_v55  ;;  %v4562_v50 = vadd.f32 %v630_v45, %v330_v56  ;;  %v559_v51 = vpop.f32.mrb[11].mxu1  ;;  %v632_v63 = vpop.f32.mrb[19].mxu0 }
 0x23f   :  { %4945 = vst [vmem:[#allocation28_spill] sm:$0xff] %v4556_v18  ;;  %4946 = vst [vmem:[#allocation29_spill] sm:$0xff] %v4558_v43  ;;  %v4564_v52 = vadd.f32 %v559_v51, %v326_v59  ;;  %v4566_v0 = vadd.f32 %v632_v63, %v334_v60 }
 0x240   :  { %4947 = vst [vmem:[#allocation30_spill] sm:$0xff] %v4560_v49  ;;  %4948 = vst [vmem:[#allocation31_spill] sm:$0xff] %v4562_v50 }
 0x241   :  { %4949 = vst [vmem:[#allocation32_spill] sm:$0xff] %v4564_v52  ;;  %4950 = vst [vmem:[#allocation33_spill] sm:$0xff] %v4566_v0 }
 0x243   :  { %v563_v5 = vpop.f32.mrb[12].mxu1  ;;  %v636_v11 = vpop.f32.mrb[20].mxu0 }
 0x244   :  { %v4568_v6 = vadd.f32 %v563_v5, %v322_v55  ;;  %v4570_v12 = vadd.f32 %v636_v11, %v330_v56  ;;  %v565_v17 = vpop.f32.mrb[13].mxu1  ;;  %v638_v43 = vpop.f32.mrb[21].mxu0  ;;  %v534_v11 = vadd.f32 %v4524_v53, %v322_v55 }
 0x245   :  { %v4572_v18 = vadd.f32 %v565_v17, %v326_v59  ;;  %v4574_v47 = vadd.f32 %v638_v43, %v334_v60  ;;  %v567_v45 = vpop.f32.mrb[14].mxu1  ;;  %v640_v50 = vpop.f32.mrb[22].mxu0  ;;  %v536_v17 = vadd.f32 %v535_v57, %v326_v59 }
 0x246   :  { %4951 = vst [vmem:[#allocation34_spill] sm:$0xff] %v4568_v6  ;;  %4952 = vst [vmem:[#allocation35_spill] sm:$0xff] %v4570_v12  ;;  %v4576_v49 = vadd.f32 %v567_v45, %v322_v55  ;;  %v4578_v51 = vadd.f32 %v640_v50, %v330_v56  ;;  %v569_v63 = vpop.f32.mrb[15].mxu1  ;;  %v642_v0 = vpop.f32.mrb[23].mxu0  ;;  %v607_v12 = vadd.f32 %v4526_v54, %v330_v56 }
 0x247   :  { %4953 = vst [vmem:[#allocation36_spill] sm:$0xff] %v4572_v18  ;;  %4954 = vst [vmem:[#allocation37_spill] sm:$0xff] %v4574_v47  ;;  %v4580_v52 = vadd.f32 %v569_v63, %v326_v59  ;;  %v4582_v5 = vadd.f32 %v642_v0, %v334_v60  ;;  %v609_v18 = vadd.f32 %v608_v58, %v334_v60 }
 0x248   :  { %4955 = vst [vmem:[#allocation38_spill] sm:$0xff] %v4576_v49  ;;  %4956 = vst [vmem:[#allocation39_spill] sm:$0xff] %v4578_v51 }
 0x249   :  { %4957 = vst [vmem:[#allocation40_spill] sm:$0xff] %v4580_v52  ;;  %4958 = vst [vmem:[#allocation41_spill] sm:$0xff] %v4582_v5 }
 0x24b   :  { %v910_v43 = vpop.f32.mrb[16].mxu1  ;;  %v951_v47 = vpop.f32.mrb[24].mxu0 }
 0x24c   :  { %v958_v6 = vadd.f32 %v910_v43, %v534_v11  ;;  %v960_v48 = vadd.f32 %v951_v47, %v607_v12  ;;  %v912_v45 = vpop.f32.mrb[17].mxu1  ;;  %v953_v49 = vpop.f32.mrb[25].mxu0 }
 0x24d   :  { %v959_v50 = vadd.f32 %v912_v45, %v536_v17  ;;  %v961_v51 = vadd.f32 %v953_v49, %v609_v18  ;;  %v914_v42 = vpop.f32.mrb[18].mxu1  ;;  %v955_v21 = vpop.f32.mrb[26].mxu0 }
 0x24e   :  { %v3440_v63 = vmul.f32 -1.442695, %v958_v6  ;;  %v915_v52 = vpop.f32.mrb[19].mxu1  ;;  %v956_v0 = vpop.f32.mrb[27].mxu0  ;;  %v3442_v53 = vmul.f32 -1.442695, %v960_v48 }
 0x24f   :  { %v3441_v5 = vmul.f32 -1.442695, %v959_v50 }
 0x250   :  { %3976 = vpow2.f32 %v3440_v63 }
 0x251   :  { %3978 = vpow2.f32 %v3441_v5 }
 0x252   :  { %3980 = vtanh.f32 %v961_v51  ;;  %v4959_v51 = vmov 0  }
 0x253   :  { %3982 = vpow2.f32 %v3442_v53 }
 0x25a   :  { %v3977_v54 = vpop.eup %3976 }
 0x25b   :  { %v971_v55 = vadd.f32 1.0, %v3977_v54  ;;  %v3979_v56 = vpop.eup %3978 }
 0x25c   :  { %v972_v57 = vadd.f32 1.0, %v3979_v56  ;;  %v3981_v58 = vpop.eup %3980 }
 0x25d   :  { %3984 = vrcp.f32 %v971_v55  ;;  %v3983_v59 = vpop.eup %3982 }
 0x25e   :  { %3986 = vrcp.f32 %v972_v57  ;;  %v973_v49 = vadd.f32 1.0, %v3983_v59 }
 0x260   :  { %3988 = vrcp.f32 %v973_v49 }
 0x267   :  { %v3985_v60 = vpop.eup %3984 }
 0x268   :  { %v982_v42 = vmul.f32 %v3985_v60, %v3981_v58  ;;  %v3987_v21 = vpop.eup %3986 }
 0x269   :  { %v981_v52 = vmul.f32 0.0, %v3987_v21 }
 0x26a   :  { %v3989_v48 = vpop.eup %3988 }
 0x26b   :  { %v4586_v6 = vadd.f32 %v982_v42, %v981_v52 }
 0x26d   :  { %3990 = vtanh.f32 %v4586_v6 }
 0x277   :  { %v3991_v18 = vpop.eup %3990 }
 0x278   :  { %v985_v12 = vmul.f32 %v3991_v18, %v3989_v48 }
 0x27a   :  { %v986_v47 = vpack.c.bf16 %v985_v12, %v985_v12 }
 0x27c   :  { %987 = vst [vmem:[#allocation5] sm:$0xf] %v986_v47  ;;  %1218 = vmatmul.mubr.bf16.vlgmr.msra.gmra.mrb[20].mxu1 %v986_v47  ;;  %1259 = vmatmul.mubr.bf16.vlgmr.msra.gmra.mrb[28].mxu0 %v986_v47 }
 0x27d   :  { %1496 = vmatpush1.bf16.msra.mxu1 %v4387_v61  ;;  %1537 = vmatpush1.bf16.msra.mxu0 %v4389_v62 }
 0x27e   :  { %1497 = vmatprep.subr.bf16.mxu1 %v4391_v1  ;;  %1538 = vmatprep.subr.bf16.mxu0 %v4393_v2 }
 0x27f   :  { %1527 = vmatprep.mubr.bf16.mxu1 %v4959_v51  ;;  %1568 = vmatprep.mubr.bf16.mxu0 %v4959_v51 }
 0x281   :  { %1498 = vmatpush1.bf16.msra.mxu1 %v4397_v8  ;;  %1539 = vmatpush1.bf16.msra.mxu0 %v4399_v9 }
 0x282   :  { %1499 = vmatprep.subr.bf16.mxu1 %v4403_v14  ;;  %1540 = vmatprep.subr.bf16.mxu0 %v4405_v15 }
 0x285   :  { %1500 = vmatpush1.bf16.msra.mxu1 %v4411_v19  ;;  %1541 = vmatpush1.bf16.msra.mxu0 %v4413_v20 }
 0x286   :  { %1501 = vmatprep.subr.bf16.mxu1 %v4417_v22  ;;  %1542 = vmatprep.subr.bf16.mxu0 %v4419_v23 }
 0x289   :  { %1502 = vmatpush1.bf16.msra.mxu1 %v4423_v24  ;;  %1543 = vmatpush1.bf16.msra.mxu0 %v4425_v25 }
 0x28a   :  { %1503 = vmatprep.subr.bf16.mxu1 %v4429_v26  ;;  %1544 = vmatprep.subr.bf16.mxu0 %v4431_v27 }
 0x28d   :  { %1504 = vmatpush1.bf16.msra.mxu1 %v4437_v28  ;;  %1545 = vmatpush1.bf16.msra.mxu0 %v4439_v29 }
 0x28e   :  { %1505 = vmatprep.subr.bf16.mxu1 %v4443_v30  ;;  %1546 = vmatprep.subr.bf16.mxu0 %v4445_v31 }
 0x291   :  { %1506 = vmatpush1.bf16.msra.mxu1 %v4449_v32  ;;  %1547 = vmatpush1.bf16.msra.mxu0 %v4451_v33 }
 0x292   :  { %1507 = vmatprep.subr.bf16.mxu1 %v4455_v34  ;;  %1548 = vmatprep.subr.bf16.mxu0 %v4457_v35 }
 0x295   :  { %1508 = vmatpush1.bf16.msra.mxu1 %v4463_v36  ;;  %1549 = vmatpush1.bf16.msra.mxu0 %v4465_v37 }
 0x296   :  { %1509 = vmatprep.subr.bf16.mxu1 %v4469_v38  ;;  %1550 = vmatprep.subr.bf16.mxu0 %v4471_v39 }
 0x299   :  { %1510 = vmatpush1.bf16.msra.mxu1 %v4475_v40  ;;  %1551 = vmatpush1.bf16.msra.mxu0 %v4477_v41 }
 0x29a   :  { %1805 = vmatprep.subr.bf16.mxu1 %v4376_v44  ;;  %1846 = vmatprep.subr.bf16.mxu0 %v4380_v46 }
 0x34f   :  { %v1219_v5 = vpop.f32.mrb[20].mxu1  ;;  %v1260_v11 = vpop.f32.mrb[28].mxu0 }
 0x350   :  { %v1267_v17 = vadd.f32 %v1219_v5, %v4528_v3  ;;  %v1269_v43 = vadd.f32 %v1260_v11, %v4530_v4  ;;  %v1221_v45 = vpop.f32.mrb[21].mxu1  ;;  %v1262_v50 = vpop.f32.mrb[29].mxu0  ;;  %v4673_v11 = vld [vmem:[#allocation12 + $0x4] ss:$16 sps:$4 sm:$0xff]  }
 0x351   :  { %v1268_v63 = vadd.f32 %v1221_v45, %v4532_v7  ;;  %v1270_v0 = vadd.f32 %v1262_v50, %v4534_v10  ;;  %v1223_v53 = vpop.f32.mrb[22].mxu1  ;;  %v1264_v54 = vpop.f32.mrb[30].mxu0  ;;  %v4679_v45 = vld [vmem:[#allocation12 + $0x8] ss:$16 sps:$4 sm:$0xff]   ;;  %v4685_v50 = vld [vmem:[#allocation12 + $0x24] ss:$16 sps:$4 sm:$0xff]  }
 0x352   :  { %v3475_v55 = vmul.f32 -1.442695, %v1267_v17  ;;  %v1224_v56 = vpop.f32.mrb[23].mxu1  ;;  %v1265_v57 = vpop.f32.mrb[31].mxu0  ;;  %v3477_v46 = vmul.f32 -1.442695, %v1269_v43 }
 0x353   :  { %v3476_v44 = vmul.f32 -1.442695, %v1268_v63  ;;  %v4675_v17 = vld [vmem:[#allocation12 + $0xc] ss:$16 sps:$4 sm:$0xff]   ;;  %v4677_v43 = vld [vmem:[#allocation12] ss:$16 sps:$4 sm:$0xff]  }
 0x354   :  { %3992 = vpow2.f32 %v3475_v55  ;;  %v4687_v63 = vld [vmem:[#allocation12 + $0x2c] ss:$16 sps:$4 sm:$0xff]   ;;  %v4691_v53 = vld [vmem:[#allocation12 + $0x28] ss:$16 sps:$4 sm:$0xff]   ;;  %v4697_v54 = vld [vmem:[#allocation12 + $0x44] ss:$16 sps:$4 sm:$0xff]  }
 0x355   :  { %3994 = vpow2.f32 %v3476_v44  ;;  %v4699_v55 = vld [vmem:[#allocation12 + $0x4c] ss:$16 sps:$4 sm:$0xff]   ;;  %v4701_v56 = vld [vmem:[#allocation12 + $0x40] ss:$16 sps:$4 sm:$0xff]   ;;  %v4703_v57 = vld [vmem:[#allocation12 + $0x48] ss:$16 sps:$4 sm:$0xff]  }
 0x356   :  { %3996 = vtanh.f32 %v1270_v0  ;;  %v4689_v0 = vld [vmem:[#allocation12 + $0x20] ss:$16 sps:$4 sm:$0xff]   ;;  %v4709_v44 = vld [vmem:[#allocation12 + $0x64] ss:$16 sps:$4 sm:$0xff]  }
 0x357   :  { %3998 = vpow2.f32 %v3477_v46  ;;  %v4711_v46 = vld [vmem:[#allocation12 + $0x6c] ss:$16 sps:$4 sm:$0xff]  }
 0x35e   :  { %v3993_v58 = vpop.eup %3992 }
 0x35f   :  { %v1280_v59 = vadd.f32 1.0, %v3993_v58  ;;  %v3995_v3 = vpop.eup %3994  ;;  %v4713_v58 = vld [vmem:[#allocation12 + $0x60] ss:$16 sps:$4 sm:$0xff]  }
 0x360   :  { %v1281_v4 = vadd.f32 1.0, %v3995_v3  ;;  %v3997_v7 = vpop.eup %3996  ;;  %v4721_v3 = vld [vmem:[#allocation12 + $0x84] ss:$16 sps:$4 sm:$0xff]  }
 0x361   :  { %4000 = vrcp.f32 %v1280_v59  ;;  %v3999_v60 = vpop.eup %3998  ;;  %v4715_v59 = vld [vmem:[#allocation12 + $0x68] ss:$16 sps:$4 sm:$0xff]  }
 0x362   :  { %4002 = vrcp.f32 %v1281_v4  ;;  %v1282_v49 = vadd.f32 1.0, %v3999_v60  ;;  %v4723_v4 = vld [vmem:[#allocation12 + $0x8c] ss:$16 sps:$4 sm:$0xff]   ;;  %v4727_v60 = vld [vmem:[#allocation12 + $0x88] ss:$16 sps:$4 sm:$0xff]  }
 0x364   :  { %4004 = vrcp.f32 %v1282_v49  ;;  %v4739_v49 = vld [vmem:[#allocation12 + $0xac] ss:$16 sps:$4 sm:$0xff]  }
 0x36b   :  { %v4001_v10 = vpop.eup %4000 }
 0x36c   :  { %v1291_v42 = vmul.f32 %v4001_v10, %v3997_v7  ;;  %v4003_v21 = vpop.eup %4002  ;;  %v4725_v7 = vld [vmem:[#allocation12 + $0x80] ss:$16 sps:$4 sm:$0xff]  }
 0x36d   :  { %v1290_v52 = vmul.f32 %v4003_v21, %v4586_v6  ;;  %v4733_v10 = vld [vmem:[#allocation12 + $0xa0] ss:$16 sps:$4 sm:$0xff]   ;;  %v4737_v21 = vld [vmem:[#allocation12 + $0xa8] ss:$16 sps:$4 sm:$0xff]  }
 0x36e   :  { %v4005_v18 = vpop.eup %4004 }
 0x36f   :  { %v4628_v48 = vadd.f32 %v1291_v42, %v1290_v52  ;;  %v4735_v42 = vld [vmem:[#allocation12 + $0xa4] ss:$16 sps:$4 sm:$0xff]  }
 0x370   :  { %v4741_v52 = vld [vmem:[#allocation12 + $0xc4] ss:$16 sps:$4 sm:$0xff]  }
 0x371   :  { %4006 = vtanh.f32 %v4628_v48 }
 0x37b   :  { %v4007_v12 = vpop.eup %4006 }
 0x37c   :  { %v1294_v47 = vmul.f32 %v4007_v12, %v4005_v18  ;;  %v4749_v18 = vld [vmem:[#allocation12 + $0xc0] ss:$16 sps:$4 sm:$0xff]   ;;  %v4751_v12 = vld [vmem:[#allocation12 + $0xc8] ss:$16 sps:$4 sm:$0xff]  }
 0x37e   :  { %v1295_v5 = vpack.c.bf16 %v1294_v47, %v1294_v47  ;;  %v4755_v47 = vld [vmem:[#allocation12 + $0xe4] ss:$16 sps:$4 sm:$0xff]  }
 0x380   :  { %1297 = vst [vmem:[#allocation5 + $0x4] sm:$0xf] %v1295_v5  ;;  %1528 = vmatmul.mubr.bf16.vlgmr.msra.gmra.mrb[24].mxu1 %v1295_v5  ;;  %1569 = vmatmul.mubr.bf16.vlgmr.msra.gmra.mrb[32].mxu0 %v1295_v5  ;;  %v4757_v5 = vld [vmem:[#allocation12 + $0xec] ss:$16 sps:$4 sm:$0xff]  }
 0x381   :  { %1806 = vmatpush1.bf16.msra.mxu1 %v4387_v61  ;;  %1847 = vmatpush1.bf16.msra.mxu0 %v4389_v62 }
 0x382   :  { %1807 = vmatprep.subr.bf16.mxu1 %v4391_v1  ;;  %1848 = vmatprep.subr.bf16.mxu0 %v4393_v2 }
 0x383   :  { %1837 = vmatprep.mubr.bf16.mxu1 %v4959_v51  ;;  %1878 = vmatprep.mubr.bf16.mxu0 %v4959_v51 }
 0x385   :  { %1808 = vmatpush1.bf16.msra.mxu1 %v4397_v8  ;;  %1849 = vmatpush1.bf16.msra.mxu0 %v4399_v9 }
 0x386   :  { %1809 = vmatprep.subr.bf16.mxu1 %v4403_v14  ;;  %1850 = vmatprep.subr.bf16.mxu0 %v4405_v15  ;;  %v4960_v14 = vld [vmem:[#allocation20_spill] sm:$0xff] }
 0x389   :  { %1810 = vmatpush1.bf16.msra.mxu1 %v4411_v19  ;;  %1851 = vmatpush1.bf16.msra.mxu0 %v4413_v20  ;;  %v4961_v19 = vld [vmem:[#allocation21_spill] sm:$0xff] }
 0x38a   :  { %1811 = vmatprep.subr.bf16.mxu1 %v4417_v22  ;;  %1852 = vmatprep.subr.bf16.mxu0 %v4419_v23 }
 0x38d   :  { %1812 = vmatpush1.bf16.msra.mxu1 %v4423_v24  ;;  %1853 = vmatpush1.bf16.msra.mxu0 %v4425_v25 }
 0x38e   :  { %1813 = vmatprep.subr.bf16.mxu1 %v4429_v26  ;;  %1854 = vmatprep.subr.bf16.mxu0 %v4431_v27 }
 0x391   :  { %1814 = vmatpush1.bf16.msra.mxu1 %v4437_v28  ;;  %1855 = vmatpush1.bf16.msra.mxu0 %v4439_v29 }
 0x392   :  { %1815 = vmatprep.subr.bf16.mxu1 %v4443_v30  ;;  %1856 = vmatprep.subr.bf16.mxu0 %v4445_v31 }
 0x395   :  { %1816 = vmatpush1.bf16.msra.mxu1 %v4449_v32  ;;  %1857 = vmatpush1.bf16.msra.mxu0 %v4451_v33 }
 0x396   :  { %1817 = vmatprep.subr.bf16.mxu1 %v4455_v34  ;;  %1858 = vmatprep.subr.bf16.mxu0 %v4457_v35 }
 0x399   :  { %1818 = vmatpush1.bf16.msra.mxu1 %v4463_v36  ;;  %1859 = vmatpush1.bf16.msra.mxu0 %v4465_v37 }
 0x39a   :  { %1819 = vmatprep.subr.bf16.mxu1 %v4469_v38  ;;  %1860 = vmatprep.subr.bf16.mxu0 %v4471_v39 }
 0x39d   :  { %1820 = vmatpush1.bf16.msra.mxu1 %v4475_v40  ;;  %1861 = vmatpush1.bf16.msra.mxu0 %v4477_v41 }
 0x39e   :  { %2115 = vmatprep.subr.bf16.mxu1 %v4673_v11  ;;  %2156 = vmatprep.subr.bf16.mxu0 %v4675_v17 }
 0x453   :  { %v1529_v61 = vpop.f32.mrb[24].mxu1  ;;  %v1570_v62 = vpop.f32.mrb[32].mxu0 }
 0x454   :  { %v1577_v1 = vadd.f32 %v1529_v61, %v4536_v13  ;;  %v1579_v2 = vadd.f32 %v1570_v62, %v4538_v16  ;;  %v1531_v8 = vpop.f32.mrb[25].mxu1  ;;  %v1572_v9 = vpop.f32.mrb[33].mxu0  ;;  %v4761_v61 = vld [vmem:[#allocation12 + $0xe0] ss:$16 sps:$4 sm:$0xff]   ;;  %v4763_v62 = vld [vmem:[#allocation12 + $0xe8] ss:$16 sps:$4 sm:$0xff]  }
 0x455   :  { %v1578_v15 = vadd.f32 %v1531_v8, %v4960_v14  ;;  %v1580_v20 = vadd.f32 %v1572_v9, %v4961_v19  ;;  %v1533_v22 = vpop.f32.mrb[26].mxu1  ;;  %v1574_v23 = vpop.f32.mrb[34].mxu0  ;;  %v4962_v8 = vld [vmem:[#allocation22_spill] sm:$0xff]  ;;  %v4963_v14 = vld [vmem:[#allocation23_spill] sm:$0xff] }
 0x456   :  { %v3510_v24 = vmul.f32 -1.442695, %v1577_v1  ;;  %v1534_v25 = vpop.f32.mrb[27].mxu1  ;;  %v1575_v26 = vpop.f32.mrb[35].mxu0  ;;  %v3512_v28 = vmul.f32 -1.442695, %v1579_v2 }
 0x457   :  { %v3511_v27 = vmul.f32 -1.442695, %v1578_v15  ;;  %v4964_v22 = vld [vmem:[#allocation24_spill] sm:$0xff] }
 0x458   :  { %4008 = vpow2.f32 %v3510_v24  ;;  %v4965_v24 = vld [vmem:[#allocation25_spill] sm:$0xff] }
 0x459   :  { %4010 = vpow2.f32 %v3511_v27 }
 0x45a   :  { %4012 = vtanh.f32 %v1580_v20 }
 0x45b   :  { %4014 = vpow2.f32 %v3512_v28 }
 0x462   :  { %v4009_v29 = vpop.eup %4008 }
 0x463   :  { %v1590_v30 = vadd.f32 1.0, %v4009_v29  ;;  %v4011_v31 = vpop.eup %4010 }
 0x464   :  { %v1591_v32 = vadd.f32 1.0, %v4011_v31  ;;  %v4013_v33 = vpop.eup %4012 }
 0x465   :  { %4016 = vrcp.f32 %v1590_v30  ;;  %v4015_v34 = vpop.eup %4014 }
 0x466   :  { %4018 = vrcp.f32 %v1591_v32  ;;  %v1592_v38 = vadd.f32 1.0, %v4015_v34 }
 0x468   :  { %4020 = vrcp.f32 %v1592_v38 }
 0x46f   :  { %v4017_v35 = vpop.eup %4016 }
 0x470   :  { %v1601_v36 = vmul.f32 %v4017_v35, %v4013_v33  ;;  %v4019_v37 = vpop.eup %4018 }
 0x471   :  { %v1600_v39 = vmul.f32 %v4019_v37, %v4628_v48  ;;  %v4744_v48 = vld [vmem:[#allocation12 + $0xcc] ss:$16 sps:$4 sm:$0xff]  }
 0x472   :  { %v4021_v41 = vpop.eup %4020 }
 0x473   :  { %v4668_v40 = vadd.f32 %v1601_v36, %v1600_v39 }
 0x475   :  { %4022 = vtanh.f32 %v4668_v40 }
 0x47f   :  { %v4023_v13 = vpop.eup %4022 }
 0x480   :  { %v1604_v16 = vmul.f32 %v4023_v13, %v4021_v41 }
 0x482   :  { %v1605_v6 = vpack.c.bf16 %v1604_v16, %v1604_v16 }
 0x484   :  { %1607 = vst [vmem:[#allocation5 + $0x8] sm:$0xf] %v1605_v6  ;;  %1838 = vmatmul.mubr.bf16.vlgmr.msra.gmra.mrb[28].mxu1 %v1605_v6  ;;  %1879 = vmatmul.mubr.bf16.vlgmr.msra.gmra.mrb[36].mxu0 %v1605_v6 }
 0x485   :  { %2147 = vmatprep.mubr.bf16.mxu1 %v4959_v51  ;;  %2188 = vmatprep.mubr.bf16.mxu0 %v4959_v51 }
 0x486   :  { %2116 = vmatpush1.bf16.msra.mxu1 %v4677_v43  ;;  %2157 = vmatpush1.bf16.msra.mxu0 %v4679_v45 }
 0x487   :  { %2117 = vmatprep.subr.bf16.mxu1 %v4685_v50  ;;  %2158 = vmatprep.subr.bf16.mxu0 %v4687_v63 }
 0x48a   :  { %2118 = vmatpush1.bf16.msra.mxu1 %v4689_v0  ;;  %2159 = vmatpush1.bf16.msra.mxu0 %v4691_v53 }
 0x48b   :  { %2119 = vmatprep.subr.bf16.mxu1 %v4697_v54  ;;  %2160 = vmatprep.subr.bf16.mxu0 %v4699_v55 }
 0x48e   :  { %2120 = vmatpush1.bf16.msra.mxu1 %v4701_v56  ;;  %2161 = vmatpush1.bf16.msra.mxu0 %v4703_v57 }
 0x48f   :  { %2121 = vmatprep.subr.bf16.mxu1 %v4709_v44  ;;  %2162 = vmatprep.subr.bf16.mxu0 %v4711_v46 }
 0x492   :  { %2122 = vmatpush1.bf16.msra.mxu1 %v4713_v58  ;;  %2163 = vmatpush1.bf16.msra.mxu0 %v4715_v59 }
 0x493   :  { %2123 = vmatprep.subr.bf16.mxu1 %v4721_v3  ;;  %2164 = vmatprep.subr.bf16.mxu0 %v4723_v4 }
 0x496   :  { %2124 = vmatpush1.bf16.msra.mxu1 %v4725_v7  ;;  %2165 = vmatpush1.bf16.msra.mxu0 %v4727_v60 }
 0x497   :  { %2125 = vmatprep.subr.bf16.mxu1 %v4735_v42  ;;  %2166 = vmatprep.subr.bf16.mxu0 %v4739_v49 }
 0x49a   :  { %2126 = vmatpush1.bf16.msra.mxu1 %v4733_v10  ;;  %2167 = vmatpush1.bf16.msra.mxu0 %v4737_v21 }
 0x49b   :  { %2127 = vmatprep.subr.bf16.mxu1 %v4741_v52  ;;  %2168 = vmatprep.subr.bf16.mxu0 %v4744_v48 }
 0x49e   :  { %2128 = vmatpush1.bf16.msra.mxu1 %v4749_v18  ;;  %2169 = vmatpush1.bf16.msra.mxu0 %v4751_v12 }
 0x49f   :  { %2129 = vmatprep.subr.bf16.mxu1 %v4755_v47  ;;  %2170 = vmatprep.subr.bf16.mxu0 %v4757_v5 }
 0x4a2   :  { %2130 = vmatpush1.bf16.msra.mxu1 %v4761_v61  ;;  %2171 = vmatpush1.bf16.msra.mxu0 %v4763_v62 }
 0x4a3   :  { %2425 = vmatprep.subr.bf16.mxu1 %v4673_v11  ;;  %2466 = vmatprep.subr.bf16.mxu0 %v4675_v17 }
 0x557   :  { %v1839_v1 = vpop.f32.mrb[28].mxu1  ;;  %v1880_v2 = vpop.f32.mrb[36].mxu0 }
 0x558   :  { %v1887_v9 = vadd.f32 %v1839_v1, %v4962_v8  ;;  %v1889_v15 = vadd.f32 %v1880_v2, %v4963_v14  ;;  %v1841_v19 = vpop.f32.mrb[29].mxu1  ;;  %v1882_v20 = vpop.f32.mrb[37].mxu0 }
 0x559   :  { %v1888_v23 = vadd.f32 %v1841_v19, %v4964_v22  ;;  %v1890_v25 = vadd.f32 %v1882_v20, %v4965_v24  ;;  %v1843_v26 = vpop.f32.mrb[30].mxu1  ;;  %v1884_v27 = vpop.f32.mrb[38].mxu0  ;;  %v4966_v19 = vld [vmem:[#allocation26_spill] sm:$0xff]  ;;  %v4967_v22 = vld [vmem:[#allocation27_spill] sm:$0xff] }
 0x55a   :  { %v3545_v28 = vmul.f32 -1.442695, %v1887_v9  ;;  %v1844_v29 = vpop.f32.mrb[31].mxu1  ;;  %v1885_v30 = vpop.f32.mrb[39].mxu0  ;;  %v3547_v32 = vmul.f32 -1.442695, %v1889_v15 }
 0x55b   :  { %v3546_v31 = vmul.f32 -1.442695, %v1888_v23  ;;  %v4968_v26 = vld [vmem:[#allocation28_spill] sm:$0xff] }
 0x55c   :  { %4024 = vpow2.f32 %v3545_v28  ;;  %v4969_v28 = vld [vmem:[#allocation29_spill] sm:$0xff] }
 0x55d   :  { %4026 = vpow2.f32 %v3546_v31 }
 0x55e   :  { %4028 = vtanh.f32 %v1890_v25 }
 0x55f   :  { %4030 = vpow2.f32 %v3547_v32 }
 0x566   :  { %v4025_v33 = vpop.eup %4024 }
 0x567   :  { %v1900_v34 = vadd.f32 1.0, %v4025_v33  ;;  %v4027_v35 = vpop.eup %4026 }
 0x568   :  { %v1901_v36 = vadd.f32 1.0, %v4027_v35  ;;  %v4029_v37 = vpop.eup %4028 }
 0x569   :  { %4032 = vrcp.f32 %v1900_v34  ;;  %v4031_v38 = vpop.eup %4030 }
 0x56a   :  { %4034 = vrcp.f32 %v1901_v36  ;;  %v1902_v16 = vadd.f32 1.0, %v4031_v38 }
 0x56c   :  { %4036 = vrcp.f32 %v1902_v16 }
 0x573   :  { %v4033_v39 = vpop.eup %4032 }
 0x574   :  { %v1911_v41 = vmul.f32 %v4033_v39, %v4029_v37  ;;  %v4035_v13 = vpop.eup %4034 }
 0x575   :  { %v1910_v6 = vmul.f32 %v4035_v13, %v4668_v40 }
 0x576   :  { %v4037_v2 = vpop.eup %4036 }
 0x577   :  { %v4776_v1 = vadd.f32 %v1911_v41, %v1910_v6 }
 0x579   :  { %4038 = vtanh.f32 %v4776_v1 }
 0x583   :  { %v4039_v8 = vpop.eup %4038 }
 0x584   :  { %v1914_v9 = vmul.f32 %v4039_v8, %v4037_v2 }
 0x586   :  { %v1915_v14 = vpack.c.bf16 %v1914_v9, %v1914_v9 }
 0x588   :  { %1917 = vst [vmem:[#allocation5 + $0xc] sm:$0xf] %v1915_v14  ;;  %2148 = vmatmul.mubr.bf16.vlgmr.msra.gmra.mrb[32].mxu1 %v1915_v14  ;;  %2189 = vmatmul.mubr.bf16.vlgmr.msra.gmra.mrb[40].mxu0 %v1915_v14 }
 0x589   :  { %2426 = vmatpush1.bf16.msra.mxu1 %v4677_v43  ;;  %2467 = vmatpush1.bf16.msra.mxu0 %v4679_v45 }
 0x58a   :  { %2427 = vmatprep.subr.bf16.mxu1 %v4685_v50  ;;  %2468 = vmatprep.subr.bf16.mxu0 %v4687_v63 }
 0x58b   :  { %2457 = vmatprep.mubr.bf16.mxu1 %v4959_v51  ;;  %2498 = vmatprep.mubr.bf16.mxu0 %v4959_v51 }
 0x58d   :  { %2428 = vmatpush1.bf16.msra.mxu1 %v4689_v0  ;;  %2469 = vmatpush1.bf16.msra.mxu0 %v4691_v53 }
 0x58e   :  { %2429 = vmatprep.subr.bf16.mxu1 %v4697_v54  ;;  %2470 = vmatprep.subr.bf16.mxu0 %v4699_v55 }
 0x591   :  { %2430 = vmatpush1.bf16.msra.mxu1 %v4701_v56  ;;  %2471 = vmatpush1.bf16.msra.mxu0 %v4703_v57 }
 0x592   :  { %2431 = vmatprep.subr.bf16.mxu1 %v4709_v44  ;;  %2472 = vmatprep.subr.bf16.mxu0 %v4711_v46 }
 0x595   :  { %2432 = vmatpush1.bf16.msra.mxu1 %v4713_v58  ;;  %2473 = vmatpush1.bf16.msra.mxu0 %v4715_v59 }
 0x596   :  { %2433 = vmatprep.subr.bf16.mxu1 %v4721_v3  ;;  %2474 = vmatprep.subr.bf16.mxu0 %v4723_v4 }
 0x599   :  { %2434 = vmatpush1.bf16.msra.mxu1 %v4725_v7  ;;  %2475 = vmatpush1.bf16.msra.mxu0 %v4727_v60 }
 0x59a   :  { %2435 = vmatprep.subr.bf16.mxu1 %v4735_v42  ;;  %2476 = vmatprep.subr.bf16.mxu0 %v4739_v49 }
 0x59d   :  { %2436 = vmatpush1.bf16.msra.mxu1 %v4733_v10  ;;  %2477 = vmatpush1.bf16.msra.mxu0 %v4737_v21 }
 0x59e   :  { %2437 = vmatprep.subr.bf16.mxu1 %v4741_v52  ;;  %2478 = vmatprep.subr.bf16.mxu0 %v4744_v48 }
 0x5a1   :  { %2438 = vmatpush1.bf16.msra.mxu1 %v4749_v18  ;;  %2479 = vmatpush1.bf16.msra.mxu0 %v4751_v12 }
 0x5a2   :  { %2439 = vmatprep.subr.bf16.mxu1 %v4755_v47  ;;  %2480 = vmatprep.subr.bf16.mxu0 %v4757_v5 }
 0x5a5   :  { %2440 = vmatpush1.bf16.msra.mxu1 %v4761_v61  ;;  %2481 = vmatpush1.bf16.msra.mxu0 %v4763_v62 }
 0x5a6   :  { %2735 = vmatprep.subr.bf16.mxu1 %v4673_v11  ;;  %2776 = vmatprep.subr.bf16.mxu0 %v4675_v17 }
 0x65b   :  { %v2149_v40 = vpop.f32.mrb[32].mxu1  ;;  %v2190_v15 = vpop.f32.mrb[40].mxu0 }
 0x65c   :  { %v2197_v20 = vadd.f32 %v2149_v40, %v4966_v19  ;;  %v2199_v23 = vadd.f32 %v2190_v15, %v4967_v22  ;;  %v2151_v24 = vpop.f32.mrb[33].mxu1  ;;  %v2192_v25 = vpop.f32.mrb[41].mxu0 }
 0x65d   :  { %v2198_v27 = vadd.f32 %v2151_v24, %v4968_v26  ;;  %v2200_v29 = vadd.f32 %v2192_v25, %v4969_v28  ;;  %v2153_v30 = vpop.f32.mrb[34].mxu1  ;;  %v2194_v31 = vpop.f32.mrb[42].mxu0  ;;  %v4970_v24 = vld [vmem:[#allocation30_spill] sm:$0xff]  ;;  %v4971_v26 = vld [vmem:[#allocation31_spill] sm:$0xff] }
 0x65e   :  { %v3580_v32 = vmul.f32 -1.442695, %v2197_v20  ;;  %v2154_v33 = vpop.f32.mrb[35].mxu1  ;;  %v2195_v34 = vpop.f32.mrb[43].mxu0  ;;  %v3582_v36 = vmul.f32 -1.442695, %v2199_v23 }
 0x65f   :  { %v3581_v35 = vmul.f32 -1.442695, %v2198_v27  ;;  %v4972_v30 = vld [vmem:[#allocation32_spill] sm:$0xff] }
 0x660   :  { %4040 = vpow2.f32 %v3580_v32  ;;  %v4973_v32 = vld [vmem:[#allocation33_spill] sm:$0xff] }
 0x661   :  { %4042 = vpow2.f32 %v3581_v35 }
 0x662   :  { %4044 = vtanh.f32 %v2200_v29 }
 0x663   :  { %4046 = vpow2.f32 %v3582_v36 }
 0x66a   :  { %v4041_v37 = vpop.eup %4040 }
 0x66b   :  { %v2210_v38 = vadd.f32 1.0, %v4041_v37  ;;  %v4043_v39 = vpop.eup %4042 }
 0x66c   :  { %v2211_v41 = vadd.f32 1.0, %v4043_v39  ;;  %v4045_v13 = vpop.eup %4044 }
 0x66d   :  { %4048 = vrcp.f32 %v2210_v38  ;;  %v4047_v16 = vpop.eup %4046 }
 0x66e   :  { %4050 = vrcp.f32 %v2211_v41  ;;  %v2212_v9 = vadd.f32 1.0, %v4047_v16 }
 0x670   :  { %4052 = vrcp.f32 %v2212_v9 }
 0x677   :  { %v4049_v6 = vpop.eup %4048 }
 0x678   :  { %v2221_v2 = vmul.f32 %v4049_v6, %v4045_v13  ;;  %v4051_v8 = vpop.eup %4050 }
 0x679   :  { %v2220_v14 = vmul.f32 %v4051_v8, %v4776_v1 }
 0x67a   :  { %v4053_v15 = vpop.eup %4052 }
 0x67b   :  { %v4818_v40 = vadd.f32 %v2221_v2, %v2220_v14 }
 0x67d   :  { %4054 = vtanh.f32 %v4818_v40 }
 0x687   :  { %v4055_v19 = vpop.eup %4054 }
 0x688   :  { %v2224_v20 = vmul.f32 %v4055_v19, %v4053_v15 }
 0x68a   :  { %v2225_v22 = vpack.c.bf16 %v2224_v20, %v2224_v20 }
 0x68c   :  { %2227 = vst [vmem:[#allocation5 + $0x10] sm:$0xf] %v2225_v22  ;;  %2458 = vmatmul.mubr.bf16.vlgmr.msra.gmra.mrb[36].mxu1 %v2225_v22  ;;  %2499 = vmatmul.mubr.bf16.vlgmr.msra.gmra.mrb[44].mxu0 %v2225_v22 }
 0x68d   :  { %2736 = vmatpush1.bf16.msra.mxu1 %v4677_v43  ;;  %2777 = vmatpush1.bf16.msra.mxu0 %v4679_v45 }
 0x68e   :  { %2737 = vmatprep.subr.bf16.mxu1 %v4685_v50  ;;  %2778 = vmatprep.subr.bf16.mxu0 %v4687_v63 }
 0x68f   :  { %2767 = vmatprep.mubr.bf16.mxu1 %v4959_v51  ;;  %2808 = vmatprep.mubr.bf16.mxu0 %v4959_v51 }
 0x691   :  { %2738 = vmatpush1.bf16.msra.mxu1 %v4689_v0  ;;  %2779 = vmatpush1.bf16.msra.mxu0 %v4691_v53 }
 0x692   :  { %2739 = vmatprep.subr.bf16.mxu1 %v4697_v54  ;;  %2780 = vmatprep.subr.bf16.mxu0 %v4699_v55 }
 0x695   :  { %2740 = vmatpush1.bf16.msra.mxu1 %v4701_v56  ;;  %2781 = vmatpush1.bf16.msra.mxu0 %v4703_v57 }
 0x696   :  { %2741 = vmatprep.subr.bf16.mxu1 %v4709_v44  ;;  %2782 = vmatprep.subr.bf16.mxu0 %v4711_v46 }
 0x699   :  { %2742 = vmatpush1.bf16.msra.mxu1 %v4713_v58  ;;  %2783 = vmatpush1.bf16.msra.mxu0 %v4715_v59 }
 0x69a   :  { %2743 = vmatprep.subr.bf16.mxu1 %v4721_v3  ;;  %2784 = vmatprep.subr.bf16.mxu0 %v4723_v4 }
 0x69d   :  { %2744 = vmatpush1.bf16.msra.mxu1 %v4725_v7  ;;  %2785 = vmatpush1.bf16.msra.mxu0 %v4727_v60 }
 0x69e   :  { %2745 = vmatprep.subr.bf16.mxu1 %v4735_v42  ;;  %2786 = vmatprep.subr.bf16.mxu0 %v4739_v49 }
 0x6a1   :  { %2746 = vmatpush1.bf16.msra.mxu1 %v4733_v10  ;;  %2787 = vmatpush1.bf16.msra.mxu0 %v4737_v21 }
 0x6a2   :  { %2747 = vmatprep.subr.bf16.mxu1 %v4741_v52  ;;  %2788 = vmatprep.subr.bf16.mxu0 %v4744_v48 }
 0x6a5   :  { %2748 = vmatpush1.bf16.msra.mxu1 %v4749_v18  ;;  %2789 = vmatpush1.bf16.msra.mxu0 %v4751_v12 }
 0x6a6   :  { %2749 = vmatprep.subr.bf16.mxu1 %v4755_v47  ;;  %2790 = vmatprep.subr.bf16.mxu0 %v4757_v5 }
 0x6a9   :  { %2750 = vmatpush1.bf16.msra.mxu1 %v4761_v61  ;;  %2791 = vmatpush1.bf16.msra.mxu0 %v4763_v62 }
 0x6aa   :  { %3045 = vmatprep.subr.bf16.mxu1 %v4673_v11  ;;  %3086 = vmatprep.subr.bf16.mxu0 %v4675_v17 }
 0x75f   :  { %v2459_v1 = vpop.f32.mrb[36].mxu1  ;;  %v2500_v23 = vpop.f32.mrb[44].mxu0 }
 0x760   :  { %v2507_v25 = vadd.f32 %v2459_v1, %v4970_v24  ;;  %v2509_v27 = vadd.f32 %v2500_v23, %v4971_v26  ;;  %v2461_v28 = vpop.f32.mrb[37].mxu1  ;;  %v2502_v29 = vpop.f32.mrb[45].mxu0 }
 0x761   :  { %v2508_v31 = vadd.f32 %v2461_v28, %v4972_v30  ;;  %v2510_v33 = vadd.f32 %v2502_v29, %v4973_v32  ;;  %v2463_v34 = vpop.f32.mrb[38].mxu1  ;;  %v2504_v35 = vpop.f32.mrb[46].mxu0  ;;  %v3966_v29 = vld [vmem:[#allocation14 + $0x8] sm:$0xff]   ;;  %v3965_v30 = vld [vmem:[#allocation5] sm:$0xff]   ;;  %v3968_v32 = vld [vmem:[#allocation14 + $0x18] sm:$0xff]  }
 0x762   :  { %v3615_v36 = vmul.f32 -1.442695, %v2507_v25  ;;  %v2464_v37 = vpop.f32.mrb[39].mxu1  ;;  %v2505_v38 = vpop.f32.mrb[47].mxu0  ;;  %v3617_v17 = vmul.f32 -1.442695, %v2509_v27 }
 0x763   :  { %v3616_v11 = vmul.f32 -1.442695, %v2508_v31  ;;  %v3967_v31 = vld [vmem:[#allocation14 + $0x10] sm:$0xff]   ;;  %v3970_v34 = vld [vmem:[#allocation14 + $0x28] sm:$0xff]  }
 0x764   :  { %4056 = vpow2.f32 %v3615_v36  ;;  %v3971_v35 = vld [vmem:[#allocation14 + $0x30] sm:$0xff]   ;;  %v3972_v36 = vld [vmem:[#allocation14 + $0x38] sm:$0xff]   ;;  %v3973_v37 = vld [vmem:[#allocation5 + $0x8] sm:$0xff]  }
 0x765   :  { %4058 = vpow2.f32 %v3616_v11 }
 0x766   :  { %4060 = vtanh.f32 %v2510_v33  ;;  %v3969_v33 = vld [vmem:[#allocation14 + $0x20] sm:$0xff]  }
 0x767   :  { %4062 = vpow2.f32 %v3617_v17 }
 0x76e   :  { %v4057_v39 = vpop.eup %4056 }
 0x76f   :  { %v2520_v41 = vadd.f32 1.0, %v4057_v39  ;;  %v4059_v13 = vpop.eup %4058  ;;  %v4978_v39 = vld [vmem:[#allocation38_spill] sm:$0xff] }
 0x770   :  { %v2521_v16 = vadd.f32 1.0, %v4059_v13  ;;  %v4061_v6 = vpop.eup %4060  ;;  %v4979_v13 = vld [vmem:[#allocation39_spill] sm:$0xff] }
 0x771   :  { %4064 = vrcp.f32 %v2520_v41  ;;  %v4063_v2 = vpop.eup %4062 }
 0x772   :  { %4066 = vrcp.f32 %v2521_v16  ;;  %v2522_v15 = vadd.f32 1.0, %v4063_v2 }
 0x774   :  { %4068 = vrcp.f32 %v2522_v15 }
 0x77b   :  { %v4065_v8 = vpop.eup %4064 }
 0x77c   :  { %v2531_v9 = vmul.f32 %v4065_v8, %v4061_v6  ;;  %v4067_v14 = vpop.eup %4066  ;;  %v4980_v8 = vld [vmem:[#allocation40_spill] sm:$0xff] }
 0x77d   :  { %v2530_v19 = vmul.f32 %v4067_v14, %v4818_v40  ;;  %v4981_v14 = vld [vmem:[#allocation41_spill] sm:$0xff] }
 0x77e   :  { %v4069_v22 = vpop.eup %4068 }
 0x77f   :  { %v4860_v20 = vadd.f32 %v2531_v9, %v2530_v19 }
 0x781   :  { %4070 = vtanh.f32 %v4860_v20 }
 0x78b   :  { %v4071_v1 = vpop.eup %4070 }
 0x78c   :  { %v2534_v23 = vmul.f32 %v4071_v1, %v4069_v22 }
 0x78e   :  { %v2535_v24 = vpack.c.bf16 %v2534_v23, %v2534_v23 }
 0x790   :  { %2537 = vst [vmem:[#allocation5 + $0x14] sm:$0xf] %v2535_v24  ;;  %2768 = vmatmul.mubr.bf16.vlgmr.msra.gmra.mrb[40].mxu1 %v2535_v24  ;;  %2809 = vmatmul.mubr.bf16.vlgmr.msra.gmra.mrb[48].mxu0 %v2535_v24 }
 0x791   :  { %3046 = vmatpush1.bf16.msra.mxu1 %v4677_v43  ;;  %3087 = vmatpush1.bf16.msra.mxu0 %v4679_v45 }
 0x792   :  { %3047 = vmatprep.subr.bf16.mxu1 %v4685_v50  ;;  %3088 = vmatprep.subr.bf16.mxu0 %v4687_v63  ;;  %v4974_v50 = vld [vmem:[#allocation34_spill] sm:$0xff] }
 0x793   :  { %3077 = vmatprep.mubr.bf16.mxu1 %v4959_v51  ;;  %3118 = vmatprep.mubr.bf16.mxu0 %v4959_v51  ;;  %v3964_v51 = vld [vmem:[#allocation14] sm:$0xff]  }
 0x795   :  { %3048 = vmatpush1.bf16.msra.mxu1 %v4689_v0  ;;  %3089 = vmatpush1.bf16.msra.mxu0 %v4691_v53  ;;  %v4975_v0 = vld [vmem:[#allocation35_spill] sm:$0xff] }
 0x796   :  { %3049 = vmatprep.subr.bf16.mxu1 %v4697_v54  ;;  %3090 = vmatprep.subr.bf16.mxu0 %v4699_v55 }
 0x797   :  { %v3974_v38 = vld [vmem:[#allocation5 + $0x10] sm:$0xff]  }
 0x799   :  { %3050 = vmatpush1.bf16.msra.mxu1 %v4701_v56  ;;  %3091 = vmatpush1.bf16.msra.mxu0 %v4703_v57  ;;  %v4976_v56 = vld [vmem:[#allocation36_spill] sm:$0xff] }
 0x79a   :  { %3051 = vmatprep.subr.bf16.mxu1 %v4709_v44  ;;  %3092 = vmatprep.subr.bf16.mxu0 %v4711_v46  ;;  %v4977_v44 = vld [vmem:[#allocation37_spill] sm:$0xff] }
 0x79d   :  { %3052 = vmatpush1.bf16.msra.mxu1 %v4713_v58  ;;  %3093 = vmatpush1.bf16.msra.mxu0 %v4715_v59 }
 0x79e   :  { %3053 = vmatprep.subr.bf16.mxu1 %v4721_v3  ;;  %3094 = vmatprep.subr.bf16.mxu0 %v4723_v4 }
 0x7a1   :  { %3054 = vmatpush1.bf16.msra.mxu1 %v4725_v7  ;;  %3095 = vmatpush1.bf16.msra.mxu0 %v4727_v60 }
 0x7a2   :  { %3055 = vmatprep.subr.bf16.mxu1 %v4735_v42  ;;  %3096 = vmatprep.subr.bf16.mxu0 %v4739_v49 }
 0x7a5   :  { %3056 = vmatpush1.bf16.msra.mxu1 %v4733_v10  ;;  %3097 = vmatpush1.bf16.msra.mxu0 %v4737_v21 }
 0x7a6   :  { %3057 = vmatprep.subr.bf16.mxu1 %v4741_v52  ;;  %3098 = vmatprep.subr.bf16.mxu0 %v4744_v48 }
 0x7a9   :  { %3058 = vmatpush1.bf16.msra.mxu1 %v4749_v18  ;;  %3099 = vmatpush1.bf16.msra.mxu0 %v4751_v12 }
 0x7aa   :  { %3059 = vmatprep.subr.bf16.mxu1 %v4755_v47  ;;  %3100 = vmatprep.subr.bf16.mxu0 %v4757_v5 }
 0x7ad   :  { %3060 = vmatpush1.bf16.msra.mxu1 %v4761_v61  ;;  %3101 = vmatpush1.bf16.msra.mxu0 %v4763_v62 }
 0x7ae   :  { %3772 = vmatprep.subr.bf16.mxu1 %v3964_v51 }
 0x863   :  { %v2769_v43 = vpop.f32.mrb[40].mxu1  ;;  %v2810_v45 = vpop.f32.mrb[48].mxu0 }
 0x864   :  { %v2817_v63 = vadd.f32 %v2769_v43, %v4974_v50  ;;  %v2819_v53 = vadd.f32 %v2810_v45, %v4975_v0  ;;  %v2771_v54 = vpop.f32.mrb[41].mxu1  ;;  %v2812_v55 = vpop.f32.mrb[49].mxu0 }
 0x865   :  { %v2818_v57 = vadd.f32 %v2771_v54, %v4976_v56  ;;  %v2820_v46 = vadd.f32 %v2812_v55, %v4977_v44  ;;  %v2773_v58 = vpop.f32.mrb[42].mxu1  ;;  %v2814_v59 = vpop.f32.mrb[50].mxu0 }
 0x866   :  { %v3650_v3 = vmul.f32 -1.442695, %v2817_v63  ;;  %v2774_v4 = vpop.f32.mrb[43].mxu1  ;;  %v2815_v7 = vpop.f32.mrb[51].mxu0  ;;  %v3652_v10 = vmul.f32 -1.442695, %v2819_v53 }
 0x867   :  { %v3651_v60 = vmul.f32 -1.442695, %v2818_v57  ;;  %v3688_v58 = vld [vmem:[%s4933_s7] ss:$0 sm:$0xff]  ;;  %s4255_s7 = smov [#allocation15]  }
 0x868   :  { %4072 = vpow2.f32 %v3650_v3  ;;  %s3349_s27 = sshll.u32 %s4255_s7, 4  ;;  %s3350_s27 = int_to_ptr.vmem [resolvable:$true] %s3349_s27 }
 0x869   :  { %4074 = vpow2.f32 %v3651_v60  ;;  %s4214_s29 = scalar_lea.vmem %s3350_s27, 512  ;;  %p4219_p13 = scmp.lt.s32.totalorder %s3350_s27, %s3350_s27 }
 0x86a   :  { %4076 = vtanh.f32 %v2820_v46  ;;  %p4215_p12 = scmp.ne.s32.totalorder %s3350_s27, %s4214_s29  ;;  %p4220_p0 = scmp.lt.s32.totalorder %s4214_s29, %s4214_s29 }
 0x86b   :  { %4078 = vpow2.f32 %v3652_v10 }
 0x86c   :  { %p4221_p1 = por %p4220_p0, %p4219_p13 }
 0x86e   :  { %p4222_p2 = pnand %p4221_p1, %p4215_p12 }
 0x872   :  { %v4073_v42 = vpop.eup %4072 }
 0x873   :  { %v2830_v21 = vadd.f32 1.0, %v4073_v42  ;;  %v4075_v49 = vpop.eup %4074 }
 0x874   :  { %v2831_v52 = vadd.f32 1.0, %v4075_v49  ;;  %v4077_v48 = vpop.eup %4076 }
 0x875   :  { %4080 = vrcp.f32 %v2830_v21  ;;  %v4079_v18 = vpop.eup %4078 }
 0x876   :  { %4082 = vrcp.f32 %v2831_v52  ;;  %v2832_v61 = vadd.f32 1.0, %v4079_v18 }
 0x878   :  { %4084 = vrcp.f32 %v2832_v61 }
 0x87f   :  { %v4081_v12 = vpop.eup %4080 }
 0x880   :  { %v2841_v47 = vmul.f32 %v4081_v12, %v4077_v48  ;;  %v4083_v5 = vpop.eup %4082 }
 0x881   :  { %v2840_v62 = vmul.f32 %v4083_v5, %v4860_v20 }
 0x882   :  { %v4085_v25 = vpop.eup %4084 }
 0x883   :  { %v4900_v40 = vadd.f32 %v2841_v47, %v2840_v62 }
 0x885   :  { %4086 = vtanh.f32 %v4900_v40 }
 0x88f   :  { %v4087_v26 = vpop.eup %4086 }
 0x890   :  { %v2844_v27 = vmul.f32 %v4087_v26, %v4085_v25 }
 0x892   :  { %v2845_v28 = vpack.c.bf16 %v2844_v27, %v2844_v27 }
 0x894   :  { %2847 = vst [vmem:[#allocation5 + $0x18] sm:$0xf] %v2845_v28  ;;  %3078 = vmatmul.mubr.bf16.vlgmr.msra.gmra.mrb[44].mxu1 %v2845_v28  ;;  %3119 = vmatmul.mubr.bf16.vlgmr.msra.gmra.mrb[52].mxu0 %v2845_v28 }
 0x895   :  { %3773 = vmatpush3.bf16.msra.mxu1 %v3964_v51  ;;  %3788 = vmatprep.mubr.bf16.mxu1 %v3965_v30 }
 0x896   :  { %3774 = vmatprep.subr.bf16.mxu1 %v3966_v29 }
 0x899   :  { %3775 = vmatpush3.bf16.msra.mxu1 %v3966_v29 }
 0x89a   :  { %3776 = vmatprep.subr.bf16.mxu1 %v3967_v31 }
 0x89d   :  { %3777 = vmatpush3.bf16.msra.mxu1 %v3967_v31 }
 0x89e   :  { %3778 = vmatprep.subr.bf16.mxu1 %v3968_v32 }
 0x8a1   :  { %3779 = vmatpush3.bf16.msra.mxu1 %v3968_v32 }
 0x8a2   :  { %3780 = vmatprep.subr.bf16.mxu1 %v3969_v33 }
 0x8a5   :  { %3781 = vmatpush3.bf16.msra.mxu1 %v3969_v33 }
 0x8a6   :  { %3782 = vmatprep.subr.bf16.mxu1 %v3970_v34 }
 0x8a9   :  { %3783 = vmatpush3.bf16.msra.mxu1 %v3970_v34 }
 0x8aa   :  { %3784 = vmatprep.subr.bf16.mxu1 %v3971_v35 }
 0x8ad   :  { %3785 = vmatpush3.bf16.msra.mxu1 %v3971_v35 }
 0x8ae   :  { %3786 = vmatprep.subr.bf16.mxu1 %v3972_v36 }
 0x8b1   :  { %3787 = vmatpush3.bf16.msra.mxu1 %v3972_v36 }
 0x8b4   :  { %3789 = vmatmul.mubr.bf16.vlgmr.msra.gmra.mrb[48].mxu1 %v3973_v37 }
 0x8b5   :  { %3792 = vmatprep.mubr.bf16.mxu1 %v3974_v38 }
 0x967   :  { %v3079_v11 = vpop.f32.mrb[44].mxu1  ;;  %v3120_v17 = vpop.f32.mrb[52].mxu0 }
 0x968   :  { %v3127_v41 = vadd.f32 %v3079_v11, %v4978_v39  ;;  %v3129_v16 = vadd.f32 %v3120_v17, %v4979_v13  ;;  %v3081_v6 = vpop.f32.mrb[45].mxu1  ;;  %v3122_v2 = vpop.f32.mrb[53].mxu0 }
 0x969   :  { %v3128_v9 = vadd.f32 %v3081_v6, %v4980_v8  ;;  %v3130_v15 = vadd.f32 %v3122_v2, %v4981_v14  ;;  %v3083_v19 = vpop.f32.mrb[46].mxu1  ;;  %v3124_v20 = vpop.f32.mrb[54].mxu0 }
 0x96a   :  { %v3685_v22 = vmul.f32 -1.442695, %v3127_v41  ;;  %v3084_v1 = vpop.f32.mrb[47].mxu1  ;;  %v3125_v23 = vpop.f32.mrb[55].mxu0  ;;  %v3687_v51 = vmul.f32 -1.442695, %v3129_v16 }
 0x96b   :  { %v3686_v24 = vmul.f32 -1.442695, %v3128_v9 }
 0x96c   :  { %4088 = vpow2.f32 %v3685_v22 }
 0x96d   :  { %4090 = vpow2.f32 %v3686_v24 }
 0x96e   :  { %4092 = vtanh.f32 %v3130_v15 }
 0x96f   :  { %4094 = vpow2.f32 %v3687_v51 }
 0x976   :  { %v4089_v43 = vpop.eup %4088 }
 0x977   :  { %v3140_v45 = vadd.f32 1.0, %v4089_v43  ;;  %v4091_v50 = vpop.eup %4090 }
 0x978   :  { %v3141_v63 = vadd.f32 1.0, %v4091_v50  ;;  %v4093_v0 = vpop.eup %4092 }
 0x979   :  { %4096 = vrcp.f32 %v3140_v45  ;;  %v4095_v53 = vpop.eup %4094 }
 0x97a   :  { %4098 = vrcp.f32 %v3141_v63  ;;  %v3142_v57 = vadd.f32 1.0, %v4095_v53 }
 0x97c   :  { %4100 = vrcp.f32 %v3142_v57 }
 0x983   :  { %v4097_v54 = vpop.eup %4096 }
 0x984   :  { %v3151_v55 = vmul.f32 %v4097_v54, %v4093_v0  ;;  %v4099_v56 = vpop.eup %4098 }
 0x985   :  { %v3150_v44 = vmul.f32 %v4099_v56, %v4900_v40 }
 0x986   :  { %v4101_v48 = vpop.eup %4100 }
 0x987   :  { %v3790_v46 = vpop.f32.mrb[48].mxu1  ;;  %v3152_v59 = vadd.f32 %v3151_v55, %v3150_v44 }
 0x988   :  { %v3297_v3 = vpop.f32.mrb[49].mxu1  ;;  %v3306_v7 = vadd.f32 %v3790_v46, %v3688_v58 }
 0x989   :  { %v3791_v4 = vpop.f32.mrb[50].mxu1  ;;  %4102 = vtanh.f32 %v3152_v59  ;;  %v3298_v42 = vadd.f32 %v3688_v58, %v3297_v3 }
 0x98a   :  { %v3309_v60 = vadd.f32 %v3791_v4, %v3688_v58  ;;  %v3300_v10 = vpop.f32.mrb[51].mxu1 }
 0x98b   :  { %v3301_v21 = vadd.f32 %v3688_v58, %v3300_v10 }
 0x98c   :  { %v3709_v49 = vpack.c.bf16 %v3309_v60, %v3306_v7 }
 0x98d   :  { %v3704_v52 = vpack.c.bf16 %v3301_v21, %v3298_v42 }
 0x98e   :  { %3721 = vst [vmem:[#allocation15 + $0x8] sm:$0xff] %v3709_v49  }
 0x98f   :  { %3705 = vst [vmem:[#allocation15] sm:$0xff] %v3704_v52  }
 0x993   :  { %v4103_v18 = vpop.eup %4102 }
 0x994   :  { %v3154_v12 = vmul.f32 %v4103_v18, %v4101_v48 }
 0x996   :  { %v3155_v47 = vpack.c.bf16 %v3154_v12, %v3154_v12 }
 0x998   :  { %3157 = vst [vmem:[#allocation5 + $0x1c] sm:$0xf] %v3155_v47 }
 0x99f   :  { %v3975_v5 = vld [vmem:[#allocation5 + $0x18] sm:$0xff]  }
 0x9a0   :  { %3793 = vmatmul.mubr.bf16.gmra.mrb[52].mxu1 %v3975_v5 }
 0xa73   :  { %v3794_v61 = vpop.f32.mrb[52].mxu1 }
 0xa74   :  { %v3313_v62 = vpop.f32.mrb[53].mxu1  ;;  %v3322_v25 = vadd.f32 %v3794_v61, %v3688_v58 }
 0xa75   :  { %v3795_v40 = vpop.f32.mrb[54].mxu1  ;;  %v3314_v28 = vadd.f32 %v3688_v58, %v3313_v62 }
 0xa76   :  { %v3325_v26 = vadd.f32 %v3795_v40, %v3688_v58  ;;  %v3316_v27 = vpop.f32.mrb[55].mxu1 }
 0xa77   :  { %v3317_v29 = vadd.f32 %v3688_v58, %v3316_v27 }
 0xa78   :  { %v3719_v30 = vpack.c.bf16 %v3325_v26, %v3322_v25 }
 0xa79   :  { %v3714_v31 = vpack.c.bf16 %v3317_v29, %v3314_v28 }
 0xa7a   :  { %3723 = vst [vmem:[#allocation15 + $0x18] sm:$0xff] %v3719_v30  }
 0xa7b   :  { %3722 = vst [vmem:[#allocation15 + $0x10] sm:$0xff] %v3714_v31  }
 0xa7c   :  { %4225 = shalt.err (!%p4222_p2)
}
 0xa7d   :  { %s4226_s10 = scalar_lea.hbm %s4934_s8, 512 }
 0xa7e   :  { %p4227_p3 = scmp.ne.s32.totalorder %s4934_s8, %s4226_s10  ;;  %p4230_p4 = scmp.lt.u32.totalorder %s4226_s10, %s4934_s8 }
 0xa80   :  { %p4232_p5 = pnand %p4230_p4, %p4227_p3 }
 0xa82   :  { %4235 = shalt.err (!%p4232_p5)
}
 0xa83   :  { %3355 = dma.vmem_to_hbm [thread:$0]  %s3350_s27, 512, %s4934_s8, [#allocation8], %s4245_s15, %s4245_s15, %s4246_s16  }
 0xa84   :  { %4242 = dma.done.wait [#allocation8], 512  }
 0xa85   :  { %4243 = vsyncadd [#allocation8], 4294966784 }
 0xa86   :  { %3359 = vsyncpa [#allocation7], 1 }
 0xa87   :  { %3360 = vsyncpa [#allocation10], 1 }
 0xa88   :  { %3361 = vsyncpa [#allocation13], 1 }
 0xa89   :  { %3362 = vsyncpa [#allocation8], 1 }

</bundles_post_ra>
